<compile_context>
chip_gen: v7x
topology: tpu7x:2x2x1
jax: 0.10.0
libtpu: 0.0.40
codegen_flags: <defaults>
</compile_context>

<pallas_src>
import functools

import jax
import jax.numpy as jnp
import numpy as np
from jax import lax
from jax.experimental import pallas as pl
from jax.experimental.pallas import tpu as pltpu


def _elu(v):
    # ELU(alpha=1): v if v > 0 else exp(v) - 1.  exp runs on the (otherwise
    # idle) EUP.  exp(v)-1 instead of expm1 to avoid relying on an expm1
    # lowering; the precision difference is far below the check tolerance.
    return jnp.where(v > 0, v, jnp.exp(v) - 1.0)


def _conv_block_kernel(W, x_ref, m_ref, pool_ref,
                       w1_ref, b1_ref, w2_ref, b2_ref, w3_ref, b3_ref,
                       o_ref, padf_ref):
    _, Cin, L = x_ref.shape      # L = Nb * H * W (Nb images lane-concatenated)
    P = W + 1                    # flat pad on each side: covers shifts +/-(W+1)

    # Zero only the two flat borders of the padded-activation scratch (NaN
    # safety against stale VMEM under the masks); the interior is fully
    # rewritten before every read.  Kept inside the body: scratch is per-core
    # when the grid is sharded across v7x's two TensorCores.
    padf_ref[:, pl.ds(0, P)] = jnp.zeros((Cin, P), jnp.float32)
    padf_ref[:, pl.ds(P + L, P)] = jnp.zeros((Cin, P), jnp.float32)

    # Per-shift border masks (f32 0/1), combined in-kernel from 4 base rows.
    # They encode per-image x/y bounds, so they also kill cross-image bleed
    # for the dx==0 shifts in the lane-concatenated layout.
    ym = m_ref[0:1, :]   # y - 1 >= 0
    yp = m_ref[1:2, :]   # y + 1 <= H-1
    xm = m_ref[2:3, :]   # x - 1 >= 0
    xp = m_ref[3:4, :]   # x + 1 <= W-1
    masks9 = [ym * xm, ym, ym * xp,
              xm,      None, xp,
              yp * xm, yp, yp * xp]

    def conv3x3(act, w_ref, b_ref):
        # act: (Cin, L) f32 -> pre-activation (Cin, L) f32, 'same' padding.
        # 9 accumulated bf16 MXU matmuls fed straight from shifted+masked lane
        # slices of the flat-padded scratch (no im2col materialization).
        padf_ref[:, pl.ds(P, L)] = act
        acc = jnp.zeros((Cin, L), jnp.float32)
        for k in range(9):                              # static unroll
            dy, dx = k // 3 - 1, k % 3 - 1
            shifted = padf_ref[:, pl.ds(P + dy * W + dx, L)]
            if masks9[k] is not None:
                shifted = shifted * masks9[k]           # f32 mask multiply
            wk = w_ref[:, pl.ds(k * Cin, Cin)]          # (Cin, Cin) bf16
            acc = acc + jnp.dot(wk, shifted.astype(jnp.bfloat16),
                                preferred_element_type=jnp.float32)
        return acc + b_ref[...]

    h = _elu(conv3x3(x_ref[0], w1_ref, b1_ref))         # conv1 3x3 + ELU
    h = _elu(conv3x3(h, w2_ref, b2_ref))                # conv2 3x3 + ELU
    h = jnp.dot(w3_ref[...], h.astype(jnp.bfloat16),    # conv3 1x1
                preferred_element_type=jnp.float32) + b3_ref[...]

    # AvgPool2d(2,2): one bf16 matmul against the block-diagonal 0.25 matrix;
    # single lane-dense (>=128-lane) store of the whole pooled slab.
    pooled = jnp.dot(h.astype(jnp.bfloat16), pool_ref[...],
                     preferred_element_type=jnp.float32)   # (Cout, Nb*HoWo)
    o_ref[0] = pooled.astype(o_ref.dtype)


def conv_block(x, params, nb=None):
    """Pallas forward of Conv_block.  x: (N, Cin, H, W) float32."""
    N, Cin, H, W = x.shape
    w1, b1, w2, b2, w3, b3 = params
    Cout = b3.shape[0]
    Ho, Wo = H // 2, W // 2
    HW, HoWo = H * W, Ho * Wo

    # Batch images per grid step until the pooled output slab is lane-dense
    # (>=128 lanes).  For real BEGAN sizes HoWo >= 128 already -> nb = 1.
    if nb is None:
        nb = 1
        while nb < N and nb * HoWo < 128 and N % (2 * nb) == 0:
            nb *= 2
    assert N % nb == 0
    G = N // nb
    L = nb * HW

    # Coordinates over the lane-concatenated (nb images) layout.
    pos = jnp.arange(L)
    img = pos // HW
    q = pos % HW
    yy = q // W
    xx = q % W

    # 4 base border-mask rows (the 9 per-shift masks are built in-kernel).
    base_masks = jnp.stack(
        [yy >= 1, yy <= H - 2, xx >= 1, xx <= W - 2],
        axis=0).astype(jnp.float32)                               # (4, L)

    # AvgPool2d(2,2) as a block-diagonal (L, nb*HoWo) bf16 matrix of 0.25.
    tgt = img * HoWo + (yy // 2) * Wo + (xx // 2)                 # (L,)
    pool = (0.25 * (tgt[:, None] == jnp.arange(nb * HoWo)[None, :])
            ).astype(jnp.bfloat16)

    # Conv weights in im2col column order (column = k*Cin + c, k = ky*3 + kx),
    # cast to bf16 for the MXU (accumulation stays f32 in-kernel).
    w1m = jnp.transpose(w1, (0, 2, 3, 1)).reshape(Cin, 9 * Cin).astype(jnp.bfloat16)
    w2m = jnp.transpose(w2, (0, 2, 3, 1)).reshape(Cin, 9 * Cin).astype(jnp.bfloat16)
    w3m = w3.reshape(Cout, Cin).astype(jnp.bfloat16)

    # Lane-concatenate nb images per grid step: (G, Cin, nb*HW).
    xg = x.reshape(G, nb, Cin, HW).transpose(0, 2, 1, 3).reshape(G, Cin, L)

    kernel = functools.partial(_conv_block_kernel, W)
    const2 = lambda g: (0, 0)

    out = pl.pallas_call(
        kernel,
        out_shape=jax.ShapeDtypeStruct((G, Cout, nb * HoWo), jnp.float32),
        grid=(G,),
        in_specs=[
            pl.BlockSpec((1, Cin, L), lambda g: (g, 0, 0)),   # x, lane-dense
            pl.BlockSpec((4, L), const2),                     # base masks f32
            pl.BlockSpec((L, nb * HoWo), const2),             # pool matrix bf16
            pl.BlockSpec((Cin, 9 * Cin), const2),             # w1 (im2col) bf16
            pl.BlockSpec((Cin, 1), const2),                   # b1 f32
            pl.BlockSpec((Cin, 9 * Cin), const2),             # w2 (im2col) bf16
            pl.BlockSpec((Cin, 1), const2),                   # b2 f32
            pl.BlockSpec((Cout, Cin), const2),                # w3 bf16
            pl.BlockSpec((Cout, 1), const2),                  # b3 f32
        ],
        out_specs=pl.BlockSpec((1, Cout, nb * HoWo), lambda g: (g, 0, 0)),
        scratch_shapes=[
            # flat-padded activations; the only remaining VMEM round trip.
            pltpu.VMEM((Cin, L + 2 * (W + 1)), jnp.float32),
        ],
        # Grid steps are independent -> both TensorCores on v7x; neutral on
        # v5e/v6e.  For real sizes, also set vmem_limit_bytes here and
        # re-derive the per-step block against v7x's 64 MiB VMEM.
        compiler_params=pltpu.CompilerParams(
            dimension_semantics=("parallel",)),
    )(xg, base_masks, pool,
      w1m, b1.reshape(Cin, 1), w2m, b2.reshape(Cin, 1),
      w3m, b3.reshape(Cout, 1))

    # (G, Cout, nb*HoWo) -> (N, Cout, Ho, Wo): layout plumbing only.
    out = out.reshape(G, Cout, nb, Ho, Wo).transpose(0, 2, 1, 3, 4)
    return out.reshape(N, Cout, Ho, Wo)


def conv_block_ref(x, params):
    """Pure-JAX reference (matches PyTorch Conv_block forward, f32)."""
    w1, b1, w2, b2, w3, b3 = params

    def conv(x, w, b, pad):
        y = lax.conv_general_dilated(
            x, w, window_strides=(1, 1), padding=[(pad, pad), (pad, pad)],
            dimension_numbers=("NCHW", "OIHW", "NCHW"))
        return y + b[None, :, None, None]

    h = jax.nn.elu(conv(x, w1, b1, 1))
    h = jax.nn.elu(conv(h, w2, b2, 1))
    h = conv(h, w3, b3, 0)
    N, C, H, W = h.shape
    return h.reshape(N, C, H // 2, 2, W // 2, 2).mean(axis=(3, 5))


if __name__ == "__main__":
    N, Cin, Cout, H, W = 2, 4, 8, 16, 16
    key = jax.random.PRNGKey(0)
    ks = jax.random.split(key, 7)

    def uinit(k, shape, fan_in):
        bound = 1.0 / float(np.sqrt(fan_in))
        return jax.random.uniform(k, shape, jnp.float32, -bound, bound)

    x = jax.random.normal(ks[0], (N, Cin, H, W), jnp.float32)
    w1 = uinit(ks[1], (Cin, Cin, 3, 3), Cin * 9)
    b1 = uinit(ks[2], (Cin,), Cin * 9)
    w2 = uinit(ks[3], (Cin, Cin, 3, 3), Cin * 9)
    b2 = uinit(ks[4], (Cin,), Cin * 9)
    w3 = uinit(ks[5], (Cout, Cin, 1, 1), Cin)
    b3 = uinit(ks[6], (Cout,), Cin)
    params = (w1, b1, w2, b2, w3, b3)

    out = jax.block_until_ready(conv_block(x, params))
    assert out.shape == (N, Cout, H // 2, W // 2), out.shape

    ref = jax.block_until_ready(conv_block_ref(x, params))
    # Tolerance sized for bf16 MXU operands (f32 accumulation) vs f32 ref.
    np.testing.assert_allclose(np.asarray(out), np.asarray(ref),
                               rtol=2e-2, atol=2e-2)

    print("KERNEL_OK")
</pallas_src>

<mosaic_0001>
module attributes {stable_mosaic.version = 11 : i64} {
  func.func @_conv_block_kernel(%arg0: i32, %arg1: memref<1x4x512xf32, #tpu.memory_space<vmem>>, %arg2: memref<4x512xf32, #tpu.memory_space<vmem>>, %arg3: memref<512x128xbf16, #tpu.memory_space<vmem>>, %arg4: memref<4x36xbf16, #tpu.memory_space<vmem>>, %arg5: memref<4x1xf32, #tpu.memory_space<vmem>>, %arg6: memref<4x36xbf16, #tpu.memory_space<vmem>>, %arg7: memref<4x1xf32, #tpu.memory_space<vmem>>, %arg8: memref<8x4xbf16, #tpu.memory_space<vmem>>, %arg9: memref<8x1xf32, #tpu.memory_space<vmem>>, %arg10: memref<1x8x128xf32, #tpu.memory_space<vmem>>, %arg11: memref<4x546xf32, #tpu.memory_space<vmem>>) attributes {dimension_semantics = [#tpu.dimension_semantics<parallel>], iteration_bounds = array<i64: 1>, scalar_prefetch = 0 : i64, scratch_operands = 1 : i64, tpu.core_type = #tpu.core_type<tc>, window_params = [{transform_indices = @transform_0, window_bounds = array<i64: 1, 4, 512>}, {pipeline_mode = #tpu.pipeline_mode<synchronous>, transform_indices = @transform_1, window_bounds = array<i64: 4, 512>}, {pipeline_mode = #tpu.pipeline_mode<synchronous>, transform_indices = @transform_2, window_bounds = array<i64: 512, 128>}, {pipeline_mode = #tpu.pipeline_mode<synchronous>, transform_indices = @transform_3, window_bounds = array<i64: 4, 36>}, {pipeline_mode = #tpu.pipeline_mode<synchronous>, transform_indices = @transform_4, window_bounds = array<i64: 4, 1>}, {pipeline_mode = #tpu.pipeline_mode<synchronous>, transform_indices = @transform_5, window_bounds = array<i64: 4, 36>}, {pipeline_mode = #tpu.pipeline_mode<synchronous>, transform_indices = @transform_6, window_bounds = array<i64: 4, 1>}, {pipeline_mode = #tpu.pipeline_mode<synchronous>, transform_indices = @transform_7, window_bounds = array<i64: 8, 4>}, {pipeline_mode = #tpu.pipeline_mode<synchronous>, transform_indices = @transform_8, window_bounds = array<i64: 8, 1>}, {transform_indices = @transform_9, window_bounds = array<i64: 1, 8, 128>}]} {
    %cst = arith.constant 0.000000e+00 : f32
    %0 = vector.broadcast %cst : f32 to vector<4x17xf32>
    %c0 = arith.constant 0 : index
    %c0_0 = arith.constant 0 : index
    %1 = vector.load %arg11[%c0, %c0_0] : memref<4x546xf32, #tpu.memory_space<vmem>>, vector<4x17xf32>
    tpu.vector_store %arg11[%c0, %c0_0], %0 {strides = array<i32>} : memref<4x546xf32, #tpu.memory_space<vmem>>, vector<4x17xf32>,
    %cst_1 = arith.constant 0.000000e+00 : f32
    %2 = vector.broadcast %cst_1 : f32 to vector<4x17xf32>
    %c0_2 = arith.constant 0 : index
    %c529 = arith.constant 529 : index
    %3 = vector.load %arg11[%c0_2, %c529] : memref<4x546xf32, #tpu.memory_space<vmem>>, vector<4x17xf32>
    tpu.vector_store %arg11[%c0_2, %c529], %2 {strides = array<i32>} : memref<4x546xf32, #tpu.memory_space<vmem>>, vector<4x17xf32>,
    %c0_3 = arith.constant 0 : index
    %c0_4 = arith.constant 0 : index
    %4 = vector.load %arg2[%c0_3, %c0_4] : memref<4x512xf32, #tpu.memory_space<vmem>>, vector<1x512xf32>
    %c1 = arith.constant 1 : index
    %c0_5 = arith.constant 0 : index
    %5 = vector.load %arg2[%c1, %c0_5] : memref<4x512xf32, #tpu.memory_space<vmem>>, vector<1x512xf32>
    %c2 = arith.constant 2 : index
    %c0_6 = arith.constant 0 : index
    %6 = vector.load %arg2[%c2, %c0_6] : memref<4x512xf32, #tpu.memory_space<vmem>>, vector<1x512xf32>
    %c3 = arith.constant 3 : index
    %c0_7 = arith.constant 0 : index
    %7 = vector.load %arg2[%c3, %c0_7] : memref<4x512xf32, #tpu.memory_space<vmem>>, vector<1x512xf32>
    %8 = arith.mulf %4, %6 : vector<1x512xf32>
    %9 = arith.mulf %4, %7 : vector<1x512xf32>
    %10 = arith.mulf %5, %6 : vector<1x512xf32>
    %11 = arith.mulf %5, %7 : vector<1x512xf32>
    %c0_8 = arith.constant 0 : index
    %c0_9 = arith.constant 0 : index
    %c0_10 = arith.constant 0 : index
    %12 = vector.load %arg1[%c0_8, %c0_9, %c0_10] : memref<1x4x512xf32, #tpu.memory_space<vmem>>, vector<1x4x512xf32>
    %13 = vector.shape_cast %12 : vector<1x4x512xf32> to vector<4x512xf32>
    %c0_11 = arith.constant 0 : index
    %c17 = arith.constant 17 : index
    %14 = vector.load %arg11[%c0_11, %c17] : memref<4x546xf32, #tpu.memory_space<vmem>>, vector<4x512xf32>
    tpu.vector_store %arg11[%c0_11, %c17], %13 {strides = array<i32>} : memref<4x546xf32, #tpu.memory_space<vmem>>, vector<4x512xf32>,
    %cst_12 = arith.constant 0.000000e+00 : f32
    %15 = vector.broadcast %cst_12 : f32 to vector<4x512xf32>
    %c0_13 = arith.constant 0 : index
    %c0_14 = arith.constant 0 : index
    %16 = vector.load %arg11[%c0_13, %c0_14] : memref<4x546xf32, #tpu.memory_space<vmem>>, vector<4x512xf32>
    %17 = vector.broadcast %8 : vector<1x512xf32> to vector<4x512xf32>
    %18 = arith.mulf %16, %17 : vector<4x512xf32>
    %c0_15 = arith.constant 0 : index
    %c0_16 = arith.constant 0 : index
    %19 = vector.load %arg4[%c0_15, %c0_16] : memref<4x36xbf16, #tpu.memory_space<vmem>>, vector<4x4xbf16>
    %20 = arith.truncf %18 : vector<4x512xf32> to vector<4x512xbf16>
    %cst_17 = arith.constant dense<0.000000e+00> : vector<4x512xf32>
    %21 = tpu.matmul %19, %20, %cst_17 {dimension_numbers = #tpu.dot_dimension_numbers<[1], [0], [0], [1], [0, 0, 1, 1], [], []>} : vector<4x4xbf16>, vector<4x512xbf16>, vector<4x512xf32> -> vector<4x512xf32>
    %22 = arith.addf %15, %21 : vector<4x512xf32>
    %c0_18 = arith.constant 0 : index
    %c1_19 = arith.constant 1 : index
    %23 = vector.load %arg11[%c0_18, %c1_19] : memref<4x546xf32, #tpu.memory_space<vmem>>, vector<4x512xf32>
    %24 = vector.broadcast %4 : vector<1x512xf32> to vector<4x512xf32>
    %25 = arith.mulf %23, %24 : vector<4x512xf32>
    %c0_20 = arith.constant 0 : index
    %c4 = arith.constant 4 : index
    %26 = vector.load %arg4[%c0_20, %c4] : memref<4x36xbf16, #tpu.memory_space<vmem>>, vector<4x4xbf16>
    %27 = arith.truncf %25 : vector<4x512xf32> to vector<4x512xbf16>
    %cst_21 = arith.constant dense<0.000000e+00> : vector<4x512xf32>
    %28 = tpu.matmul %26, %27, %cst_21 {dimension_numbers = #tpu.dot_dimension_numbers<[1], [0], [0], [1], [0, 0, 1, 1], [], []>} : vector<4x4xbf16>, vector<4x512xbf16>, vector<4x512xf32> -> vector<4x512xf32>
    %29 = arith.addf %22, %28 : vector<4x512xf32>
    %c0_22 = arith.constant 0 : index
    %c2_23 = arith.constant 2 : index
    %30 = vector.load %arg11[%c0_22, %c2_23] : memref<4x546xf32, #tpu.memory_space<vmem>>, vector<4x512xf32>
    %31 = vector.broadcast %9 : vector<1x512xf32> to vector<4x512xf32>
    %32 = arith.mulf %30, %31 : vector<4x512xf32>
    %c0_24 = arith.constant 0 : index
    %c8 = arith.constant 8 : index
    %33 = vector.load %arg4[%c0_24, %c8] : memref<4x36xbf16, #tpu.memory_space<vmem>>, vector<4x4xbf16>
    %34 = arith.truncf %32 : vector<4x512xf32> to vector<4x512xbf16>
    %cst_25 = arith.constant dense<0.000000e+00> : vector<4x512xf32>
    %35 = tpu.matmul %33, %34, %cst_25 {dimension_numbers = #tpu.dot_dimension_numbers<[1], [0], [0], [1], [0, 0, 1, 1], [], []>} : vector<4x4xbf16>, vector<4x512xbf16>, vector<4x512xf32> -> vector<4x512xf32>
    %36 = arith.addf %29, %35 : vector<4x512xf32>
    %c0_26 = arith.constant 0 : index
    %c16 = arith.constant 16 : index
    %37 = vector.load %arg11[%c0_26, %c16] : memref<4x546xf32, #tpu.memory_space<vmem>>, vector<4x512xf32>
    %38 = vector.broadcast %6 : vector<1x512xf32> to vector<4x512xf32>
    %39 = arith.mulf %37, %38 : vector<4x512xf32>
    %c0_27 = arith.constant 0 : index
    %c12 = arith.constant 12 : index
    %40 = vector.load %arg4[%c0_27, %c12] : memref<4x36xbf16, #tpu.memory_space<vmem>>, vector<4x4xbf16>
    %41 = arith.truncf %39 : vector<4x512xf32> to vector<4x512xbf16>
    %cst_28 = arith.constant dense<0.000000e+00> : vector<4x512xf32>
    %42 = tpu.matmul %40, %41, %cst_28 {dimension_numbers = #tpu.dot_dimension_numbers<[1], [0], [0], [1], [0, 0, 1, 1], [], []>} : vector<4x4xbf16>, vector<4x512xbf16>, vector<4x512xf32> -> vector<4x512xf32>
    %43 = arith.addf %36, %42 : vector<4x512xf32>
    %c0_29 = arith.constant 0 : index
    %c17_30 = arith.constant 17 : index
    %44 = vector.load %arg11[%c0_29, %c17_30] : memref<4x546xf32, #tpu.memory_space<vmem>>, vector<4x512xf32>
    %c0_31 = arith.constant 0 : index
    %c16_32 = arith.constant 16 : index
    %45 = vector.load %arg4[%c0_31, %c16_32] : memref<4x36xbf16, #tpu.memory_space<vmem>>, vector<4x4xbf16>
    %46 = arith.truncf %44 : vector<4x512xf32> to vector<4x512xbf16>
    %cst_33 = arith.constant dense<0.000000e+00> : vector<4x512xf32>
    %47 = tpu.matmul %45, %46, %cst_33 {dimension_numbers = #tpu.dot_dimension_numbers<[1], [0], [0], [1], [0, 0, 1, 1], [], []>} : vector<4x4xbf16>, vector<4x512xbf16>, vector<4x512xf32> -> vector<4x512xf32>
    %48 = arith.addf %43, %47 : vector<4x512xf32>
    %c0_34 = arith.constant 0 : index
    %c18 = arith.constant 18 : index
    %49 = vector.load %arg11[%c0_34, %c18] : memref<4x546xf32, #tpu.memory_space<vmem>>, vector<4x512xf32>
    %50 = vector.broadcast %7 : vector<1x512xf32> to vector<4x512xf32>
    %51 = arith.mulf %49, %50 : vector<4x512xf32>
    %c0_35 = arith.constant 0 : index
    %c20 = arith.constant 20 : index
    %52 = vector.load %arg4[%c0_35, %c20] : memref<4x36xbf16, #tpu.memory_space<vmem>>, vector<4x4xbf16>
    %53 = arith.truncf %51 : vector<4x512xf32> to vector<4x512xbf16>
    %cst_36 = arith.constant dense<0.000000e+00> : vector<4x512xf32>
    %54 = tpu.matmul %52, %53, %cst_36 {dimension_numbers = #tpu.dot_dimension_numbers<[1], [0], [0], [1], [0, 0, 1, 1], [], []>} : vector<4x4xbf16>, vector<4x512xbf16>, vector<4x512xf32> -> vector<4x512xf32>
    %55 = arith.addf %48, %54 : vector<4x512xf32>
    %c0_37 = arith.constant 0 : index
    %c32 = arith.constant 32 : index
    %56 = vector.load %arg11[%c0_37, %c32] : memref<4x546xf32, #tpu.memory_space<vmem>>, vector<4x512xf32>
    %57 = vector.broadcast %10 : vector<1x512xf32> to vector<4x512xf32>
    %58 = arith.mulf %56, %57 : vector<4x512xf32>
    %c0_38 = arith.constant 0 : index
    %c24 = arith.constant 24 : index
    %59 = vector.load %arg4[%c0_38, %c24] : memref<4x36xbf16, #tpu.memory_space<vmem>>, vector<4x4xbf16>
    %60 = arith.truncf %58 : vector<4x512xf32> to vector<4x512xbf16>
    %cst_39 = arith.constant dense<0.000000e+00> : vector<4x512xf32>
    %61 = tpu.matmul %59, %60, %cst_39 {dimension_numbers = #tpu.dot_dimension_numbers<[1], [0], [0], [1], [0, 0, 1, 1], [], []>} : vector<4x4xbf16>, vector<4x512xbf16>, vector<4x512xf32> -> vector<4x512xf32>
    %62 = arith.addf %55, %61 : vector<4x512xf32>
    %c0_40 = arith.constant 0 : index
    %c33 = arith.constant 33 : index
    %63 = vector.load %arg11[%c0_40, %c33] : memref<4x546xf32, #tpu.memory_space<vmem>>, vector<4x512xf32>
    %64 = vector.broadcast %5 : vector<1x512xf32> to vector<4x512xf32>
    %65 = arith.mulf %63, %64 : vector<4x512xf32>
    %c0_41 = arith.constant 0 : index
    %c28 = arith.constant 28 : index
    %66 = vector.load %arg4[%c0_41, %c28] : memref<4x36xbf16, #tpu.memory_space<vmem>>, vector<4x4xbf16>
    %67 = arith.truncf %65 : vector<4x512xf32> to vector<4x512xbf16>
    %cst_42 = arith.constant dense<0.000000e+00> : vector<4x512xf32>
    %68 = tpu.matmul %66, %67, %cst_42 {dimension_numbers = #tpu.dot_dimension_numbers<[1], [0], [0], [1], [0, 0, 1, 1], [], []>} : vector<4x4xbf16>, vector<4x512xbf16>, vector<4x512xf32> -> vector<4x512xf32>
    %69 = arith.addf %62, %68 : vector<4x512xf32>
    %c0_43 = arith.constant 0 : index
    %c34 = arith.constant 34 : index
    %70 = vector.load %arg11[%c0_43, %c34] : memref<4x546xf32, #tpu.memory_space<vmem>>, vector<4x512xf32>
    %71 = vector.broadcast %11 : vector<1x512xf32> to vector<4x512xf32>
    %72 = arith.mulf %70, %71 : vector<4x512xf32>
    %c0_44 = arith.constant 0 : index
    %c32_45 = arith.constant 32 : index
    %73 = vector.load %arg4[%c0_44, %c32_45] : memref<4x36xbf16, #tpu.memory_space<vmem>>, vector<4x4xbf16>
    %74 = arith.truncf %72 : vector<4x512xf32> to vector<4x512xbf16>
    %cst_46 = arith.constant dense<0.000000e+00> : vector<4x512xf32>
    %75 = tpu.matmul %73, %74, %cst_46 {dimension_numbers = #tpu.dot_dimension_numbers<[1], [0], [0], [1], [0, 0, 1, 1], [], []>} : vector<4x4xbf16>, vector<4x512xbf16>, vector<4x512xf32> -> vector<4x512xf32>
    %76 = arith.addf %69, %75 : vector<4x512xf32>
    %c0_47 = arith.constant 0 : index
    %c0_48 = arith.constant 0 : index
    %77 = vector.load %arg5[%c0_47, %c0_48] : memref<4x1xf32, #tpu.memory_space<vmem>>, vector<4x1xf32>
    %78 = vector.broadcast %77 : vector<4x1xf32> to vector<4x512xf32>
    %79 = arith.addf %76, %78 : vector<4x512xf32>
    %cst_49 = arith.constant 0.000000e+00 : f32
    %80 = vector.broadcast %cst_49 : f32 to vector<4x512xf32>
    %81 = arith.cmpf ogt, %79, %80 : vector<4x512xf32>
    %82 = math.exp %79 : vector<4x512xf32>
    %cst_50 = arith.constant 1.000000e+00 : f32
    %83 = vector.broadcast %cst_50 : f32 to vector<4x512xf32>
    %84 = arith.subf %82, %83 : vector<4x512xf32>
    %85 = arith.select %81, %79, %84 : vector<4x512xi1>, vector<4x512xf32>
    %c0_51 = arith.constant 0 : index
    %c17_52 = arith.constant 17 : index
    %86 = vector.load %arg11[%c0_51, %c17_52] : memref<4x546xf32, #tpu.memory_space<vmem>>, vector<4x512xf32>
    tpu.vector_store %arg11[%c0_51, %c17_52], %85 {strides = array<i32>} : memref<4x546xf32, #tpu.memory_space<vmem>>, vector<4x512xf32>,
    %cst_53 = arith.constant 0.000000e+00 : f32
    %87 = vector.broadcast %cst_53 : f32 to vector<4x512xf32>
    %c0_54 = arith.constant 0 : index
    %c0_55 = arith.constant 0 : index
    %88 = vector.load %arg11[%c0_54, %c0_55] : memref<4x546xf32, #tpu.memory_space<vmem>>, vector<4x512xf32>
    %89 = vector.broadcast %8 : vector<1x512xf32> to vector<4x512xf32>
    %90 = arith.mulf %88, %89 : vector<4x512xf32>
    %c0_56 = arith.constant 0 : index
    %c0_57 = arith.constant 0 : index
    %91 = vector.load %arg6[%c0_56, %c0_57] : memref<4x36xbf16, #tpu.memory_space<vmem>>, vector<4x4xbf16>
    %92 = arith.truncf %90 : vector<4x512xf32> to vector<4x512xbf16>
    %cst_58 = arith.constant dense<0.000000e+00> : vector<4x512xf32>
    %93 = tpu.matmul %91, %92, %cst_58 {dimension_numbers = #tpu.dot_dimension_numbers<[1], [0], [0], [1], [0, 0, 1, 1], [], []>} : vector<4x4xbf16>, vector<4x512xbf16>, vector<4x512xf32> -> vector<4x512xf32>
    %94 = arith.addf %87, %93 : vector<4x512xf32>
    %c0_59 = arith.constant 0 : index
    %c1_60 = arith.constant 1 : index
    %95 = vector.load %arg11[%c0_59, %c1_60] : memref<4x546xf32, #tpu.memory_space<vmem>>, vector<4x512xf32>
    %96 = vector.broadcast %4 : vector<1x512xf32> to vector<4x512xf32>
    %97 = arith.mulf %95, %96 : vector<4x512xf32>
    %c0_61 = arith.constant 0 : index
    %c4_62 = arith.constant 4 : index
    %98 = vector.load %arg6[%c0_61, %c4_62] : memref<4x36xbf16, #tpu.memory_space<vmem>>, vector<4x4xbf16>
    %99 = arith.truncf %97 : vector<4x512xf32> to vector<4x512xbf16>
    %cst_63 = arith.constant dense<0.000000e+00> : vector<4x512xf32>
    %100 = tpu.matmul %98, %99, %cst_63 {dimension_numbers = #tpu.dot_dimension_numbers<[1], [0], [0], [1], [0, 0, 1, 1], [], []>} : vector<4x4xbf16>, vector<4x512xbf16>, vector<4x512xf32> -> vector<4x512xf32>
    %101 = arith.addf %94, %100 : vector<4x512xf32>
    %c0_64 = arith.constant 0 : index
    %c2_65 = arith.constant 2 : index
    %102 = vector.load %arg11[%c0_64, %c2_65] : memref<4x546xf32, #tpu.memory_space<vmem>>, vector<4x512xf32>
    %103 = vector.broadcast %9 : vector<1x512xf32> to vector<4x512xf32>
    %104 = arith.mulf %102, %103 : vector<4x512xf32>
    %c0_66 = arith.constant 0 : index
    %c8_67 = arith.constant 8 : index
    %105 = vector.load %arg6[%c0_66, %c8_67] : memref<4x36xbf16, #tpu.memory_space<vmem>>, vector<4x4xbf16>
    %106 = arith.truncf %104 : vector<4x512xf32> to vector<4x512xbf16>
    %cst_68 = arith.constant dense<0.000000e+00> : vector<4x512xf32>
    %107 = tpu.matmul %105, %106, %cst_68 {dimension_numbers = #tpu.dot_dimension_numbers<[1], [0], [0], [1], [0, 0, 1, 1], [], []>} : vector<4x4xbf16>, vector<4x512xbf16>, vector<4x512xf32> -> vector<4x512xf32>
    %108 = arith.addf %101, %107 : vector<4x512xf32>
    %c0_69 = arith.constant 0 : index
    %c16_70 = arith.constant 16 : index
    %109 = vector.load %arg11[%c0_69, %c16_70] : memref<4x546xf32, #tpu.memory_space<vmem>>, vector<4x512xf32>
    %110 = vector.broadcast %6 : vector<1x512xf32> to vector<4x512xf32>
    %111 = arith.mulf %109, %110 : vector<4x512xf32>
    %c0_71 = arith.constant 0 : index
    %c12_72 = arith.constant 12 : index
    %112 = vector.load %arg6[%c0_71, %c12_72] : memref<4x36xbf16, #tpu.memory_space<vmem>>, vector<4x4xbf16>
    %113 = arith.truncf %111 : vector<4x512xf32> to vector<4x512xbf16>
    %cst_73 = arith.constant dense<0.000000e+00> : vector<4x512xf32>
    %114 = tpu.matmul %112, %113, %cst_73 {dimension_numbers = #tpu.dot_dimension_numbers<[1], [0], [0], [1], [0, 0, 1, 1], [], []>} : vector<4x4xbf16>, vector<4x512xbf16>, vector<4x512xf32> -> vector<4x512xf32>
    %115 = arith.addf %108, %114 : vector<4x512xf32>
    %c0_74 = arith.constant 0 : index
    %c17_75 = arith.constant 17 : index
    %116 = vector.load %arg11[%c0_74, %c17_75] : memref<4x546xf32, #tpu.memory_space<vmem>>, vector<4x512xf32>
    %c0_76 = arith.constant 0 : index
    %c16_77 = arith.constant 16 : index
    %117 = vector.load %arg6[%c0_76, %c16_77] : memref<4x36xbf16, #tpu.memory_space<vmem>>, vector<4x4xbf16>
    %118 = arith.truncf %116 : vector<4x512xf32> to vector<4x512xbf16>
    %cst_78 = arith.constant dense<0.000000e+00> : vector<4x512xf32>
    %119 = tpu.matmul %117, %118, %cst_78 {dimension_numbers = #tpu.dot_dimension_numbers<[1], [0], [0], [1], [0, 0, 1, 1], [], []>} : vector<4x4xbf16>, vector<4x512xbf16>, vector<4x512xf32> -> vector<4x512xf32>
    %120 = arith.addf %115, %119 : vector<4x512xf32>
    %c0_79 = arith.constant 0 : index
    %c18_80 = arith.constant 18 : index
    %121 = vector.load %arg11[%c0_79, %c18_80] : memref<4x546xf32, #tpu.memory_space<vmem>>, vector<4x512xf32>
    %122 = vector.broadcast %7 : vector<1x512xf32> to vector<4x512xf32>
    %123 = arith.mulf %121, %122 : vector<4x512xf32>
    %c0_81 = arith.constant 0 : index
    %c20_82 = arith.constant 20 : index
    %124 = vector.load %arg6[%c0_81, %c20_82] : memref<4x36xbf16, #tpu.memory_space<vmem>>, vector<4x4xbf16>
    %125 = arith.truncf %123 : vector<4x512xf32> to vector<4x512xbf16>
    %cst_83 = arith.constant dense<0.000000e+00> : vector<4x512xf32>
    %126 = tpu.matmul %124, %125, %cst_83 {dimension_numbers = #tpu.dot_dimension_numbers<[1], [0], [0], [1], [0, 0, 1, 1], [], []>} : vector<4x4xbf16>, vector<4x512xbf16>, vector<4x512xf32> -> vector<4x512xf32>
    %127 = arith.addf %120, %126 : vector<4x512xf32>
    %c0_84 = arith.constant 0 : index
    %c32_85 = arith.constant 32 : index
    %128 = vector.load %arg11[%c0_84, %c32_85] : memref<4x546xf32, #tpu.memory_space<vmem>>, vector<4x512xf32>
    %129 = vector.broadcast %10 : vector<1x512xf32> to vector<4x512xf32>
    %130 = arith.mulf %128, %129 : vector<4x512xf32>
    %c0_86 = arith.constant 0 : index
    %c24_87 = arith.constant 24 : index
    %131 = vector.load %arg6[%c0_86, %c24_87] : memref<4x36xbf16, #tpu.memory_space<vmem>>, vector<4x4xbf16>
    %132 = arith.truncf %130 : vector<4x512xf32> to vector<4x512xbf16>
    %cst_88 = arith.constant dense<0.000000e+00> : vector<4x512xf32>
    %133 = tpu.matmul %131, %132, %cst_88 {dimension_numbers = #tpu.dot_dimension_numbers<[1], [0], [0], [1], [0, 0, 1, 1], [], []>} : vector<4x4xbf16>, vector<4x512xbf16>, vector<4x512xf32> -> vector<4x512xf32>
    %134 = arith.addf %127, %133 : vector<4x512xf32>
    %c0_89 = arith.constant 0 : index
    %c33_90 = arith.constant 33 : index
    %135 = vector.load %arg11[%c0_89, %c33_90] : memref<4x546xf32, #tpu.memory_space<vmem>>, vector<4x512xf32>
    %136 = vector.broadcast %5 : vector<1x512xf32> to vector<4x512xf32>
    %137 = arith.mulf %135, %136 : vector<4x512xf32>
    %c0_91 = arith.constant 0 : index
    %c28_92 = arith.constant 28 : index
    %138 = vector.load %arg6[%c0_91, %c28_92] : memref<4x36xbf16, #tpu.memory_space<vmem>>, vector<4x4xbf16>
    %139 = arith.truncf %137 : vector<4x512xf32> to vector<4x512xbf16>
    %cst_93 = arith.constant dense<0.000000e+00> : vector<4x512xf32>
    %140 = tpu.matmul %138, %139, %cst_93 {dimension_numbers = #tpu.dot_dimension_numbers<[1], [0], [0], [1], [0, 0, 1, 1], [], []>} : vector<4x4xbf16>, vector<4x512xbf16>, vector<4x512xf32> -> vector<4x512xf32>
    %141 = arith.addf %134, %140 : vector<4x512xf32>
    %c0_94 = arith.constant 0 : index
    %c34_95 = arith.constant 34 : index
    %142 = vector.load %arg11[%c0_94, %c34_95] : memref<4x546xf32, #tpu.memory_space<vmem>>, vector<4x512xf32>
    %143 = vector.broadcast %11 : vector<1x512xf32> to vector<4x512xf32>
    %144 = arith.mulf %142, %143 : vector<4x512xf32>
    %c0_96 = arith.constant 0 : index
    %c32_97 = arith.constant 32 : index
    %145 = vector.load %arg6[%c0_96, %c32_97] : memref<4x36xbf16, #tpu.memory_space<vmem>>, vector<4x4xbf16>
    %146 = arith.truncf %144 : vector<4x512xf32> to vector<4x512xbf16>
    %cst_98 = arith.constant dense<0.000000e+00> : vector<4x512xf32>
    %147 = tpu.matmul %145, %146, %cst_98 {dimension_numbers = #tpu.dot_dimension_numbers<[1], [0], [0], [1], [0, 0, 1, 1], [], []>} : vector<4x4xbf16>, vector<4x512xbf16>, vector<4x512xf32> -> vector<4x512xf32>
    %148 = arith.addf %141, %147 : vector<4x512xf32>
    %c0_99 = arith.constant 0 : index
    %c0_100 = arith.constant 0 : index
    %149 = vector.load %arg7[%c0_99, %c0_100] : memref<4x1xf32, #tpu.memory_space<vmem>>, vector<4x1xf32>
    %150 = vector.broadcast %149 : vector<4x1xf32> to vector<4x512xf32>
    %151 = arith.addf %148, %150 : vector<4x512xf32>
    %cst_101 = arith.constant 0.000000e+00 : f32
    %152 = vector.broadcast %cst_101 : f32 to vector<4x512xf32>
    %153 = arith.cmpf ogt, %151, %152 : vector<4x512xf32>
    %154 = math.exp %151 : vector<4x512xf32>
    %cst_102 = arith.constant 1.000000e+00 : f32
    %155 = vector.broadcast %cst_102 : f32 to vector<4x512xf32>
    %156 = arith.subf %154, %155 : vector<4x512xf32>
    %157 = arith.select %153, %151, %156 : vector<4x512xi1>, vector<4x512xf32>
    %c0_103 = arith.constant 0 : index
    %c0_104 = arith.constant 0 : index
    %158 = vector.load %arg8[%c0_103, %c0_104] : memref<8x4xbf16, #tpu.memory_space<vmem>>, vector<8x4xbf16>
    %159 = arith.truncf %157 : vector<4x512xf32> to vector<4x512xbf16>
    %cst_105 = arith.constant dense<0.000000e+00> : vector<8x512xf32>
    %160 = tpu.matmul %158, %159, %cst_105 {dimension_numbers = #tpu.dot_dimension_numbers<[1], [0], [0], [1], [0, 0, 1, 1], [], []>} : vector<8x4xbf16>, vector<4x512xbf16>, vector<8x512xf32> -> vector<8x512xf32>
    %c0_106 = arith.constant 0 : index
    %c0_107 = arith.constant 0 : index
    %161 = vector.load %arg9[%c0_106, %c0_107] : memref<8x1xf32, #tpu.memory_space<vmem>>, vector<8x1xf32>
    %162 = vector.broadcast %161 : vector<8x1xf32> to vector<8x512xf32>
    %163 = arith.addf %160, %162 : vector<8x512xf32>
    %164 = arith.truncf %163 : vector<8x512xf32> to vector<8x512xbf16>
    %c0_108 = arith.constant 0 : index
    %c0_109 = arith.constant 0 : index
    %165 = vector.load %arg3[%c0_108, %c0_109] : memref<512x128xbf16, #tpu.memory_space<vmem>>, vector<512x128xbf16>
    %cst_110 = arith.constant dense<0.000000e+00> : vector<8x128xf32>
    %166 = tpu.matmul %164, %165, %cst_110 {dimension_numbers = #tpu.dot_dimension_numbers<[1], [0], [0], [1], [0, 0, 1, 1], [], []>} : vector<8x512xbf16>, vector<512x128xbf16>, vector<8x128xf32> -> vector<8x128xf32>
    %c0_111 = arith.constant 0 : index
    %c0_112 = arith.constant 0 : index
    %c0_113 = arith.constant 0 : index
    %167 = vector.load %arg10[%c0_111, %c0_112, %c0_113] : memref<1x8x128xf32, #tpu.memory_space<vmem>>, vector<1x8x128xf32>
    %168 = vector.shape_cast %167 : vector<1x8x128xf32> to vector<8x128xf32>
    %169 = vector.shape_cast %166 : vector<8x128xf32> to vector<1x8x128xf32>
    tpu.vector_store %arg10[%c0_111, %c0_112, %c0_113], %169 {strides = array<i32>} : memref<1x8x128xf32, #tpu.memory_space<vmem>>, vector<1x8x128xf32>,
    return
  }
  func.func @transform_0(%arg0: i32) -> (i32, i32, i32) {
    %c0_i32 = arith.constant 0 : i32
    %c0_i32_0 = arith.constant 0 : i32
    %c0_i32_1 = arith.constant 0 : i32
    return %arg0, %c0_i32, %c0_i32_0 : i32, i32, i32
  }
  func.func @transform_1(%arg0: i32) -> (i32, i32) {
    %c0_i32 = arith.constant 0 : i32
    %c0_i32_0 = arith.constant 0 : i32
    %c0_i32_1 = arith.constant 0 : i32
    return %c0_i32, %c0_i32_0 : i32, i32
  }
  func.func @transform_2(%arg0: i32) -> (i32, i32) {
    %c0_i32 = arith.constant 0 : i32
    %c0_i32_0 = arith.constant 0 : i32
    %c0_i32_1 = arith.constant 0 : i32
    return %c0_i32, %c0_i32_0 : i32, i32
  }
  func.func @transform_3(%arg0: i32) -> (i32, i32) {
    %c0_i32 = arith.constant 0 : i32
    %c0_i32_0 = arith.constant 0 : i32
    %c0_i32_1 = arith.constant 0 : i32
    return %c0_i32, %c0_i32_0 : i32, i32
  }
  func.func @transform_4(%arg0: i32) -> (i32, i32) {
    %c0_i32 = arith.constant 0 : i32
    %c0_i32_0 = arith.constant 0 : i32
    %c0_i32_1 = arith.constant 0 : i32
    return %c0_i32, %c0_i32_0 : i32, i32
  }
  func.func @transform_5(%arg0: i32) -> (i32, i32) {
    %c0_i32 = arith.constant 0 : i32
    %c0_i32_0 = arith.constant 0 : i32
    %c0_i32_1 = arith.constant 0 : i32
    return %c0_i32, %c0_i32_0 : i32, i32
  }
  func.func @transform_6(%arg0: i32) -> (i32, i32) {
    %c0_i32 = arith.constant 0 : i32
    %c0_i32_0 = arith.constant 0 : i32
    %c0_i32_1 = arith.constant 0 : i32
    return %c0_i32, %c0_i32_0 : i32, i32
  }
  func.func @transform_7(%arg0: i32) -> (i32, i32) {
    %c0_i32 = arith.constant 0 : i32
    %c0_i32_0 = arith.constant 0 : i32
    %c0_i32_1 = arith.constant 0 : i32
    return %c0_i32, %c0_i32_0 : i32, i32
  }
  func.func @transform_8(%arg0: i32) -> (i32, i32) {
    %c0_i32 = arith.constant 0 : i32
    %c0_i32_0 = arith.constant 0 : i32
    %c0_i32_1 = arith.constant 0 : i32
    return %c0_i32, %c0_i32_0 : i32, i32
  }
  func.func @transform_9(%arg0: i32) -> (i32, i32, i32) {
    %c0_i32 = arith.constant 0 : i32
    %c0_i32_0 = arith.constant 0 : i32
    %c0_i32_1 = arith.constant 0 : i32
    return %arg0, %c0_i32, %c0_i32_0 : i32, i32, i32
  }
}

</mosaic_0001>

<bundles_post_ra>
// kernel: tpu_custom_call.1
= control target key start
LH: loop header
LB: loop body
LE: loop exit
PB: predicated region body
PF: predicated region fallthrough
CT: control target
= control target key end

     0   :  { %14 = vsyncpa [#allocation4], 0  ;;  %s4613_s0 = inlined_call_operand.vmem [shape: f32[1,4,512], index: 0, kind: input, shape index: {}]   ;;  %s4614_s1 = inlined_call_operand.hbm [shape: f32[4,512], index: 1, kind: input, shape index: {}]   ;;  %s4615_s2 = inlined_call_operand.hbm [shape: bf16[512,128], index: 2, kind: input, shape index: {}]   ;;  %s4616_s3 = inlined_call_operand.vmem [shape: bf16[4,36], index: 3, kind: input, shape index: {}]   ;;  %s4617_s4 = inlined_call_operand.vmem [shape: f32[4,1], index: 4, kind: input, shape index: {}]   ;;  %s4618_s5 = inlined_call_operand.vmem [shape: bf16[4,36], index: 5, kind: input, shape index: {}]   ;;  %s4619_s6 = inlined_call_operand.vmem [shape: f32[4,1], index: 6, kind: input, shape index: {}]   ;;  %s4620_s7 = inlined_call_operand.vmem [shape: bf16[8,4], index: 7, kind: input, shape index: {}]   ;;  %s4621_s8 = inlined_call_operand.vmem [shape: f32[8,1], index: 8, kind: input, shape index: {}]   ;;  %s4622_s9 = inlined_call_operand.hbm [shape: f32[1,8,128], index: 9, kind: output, shape index: {}]  }
   0x1   :  { %15 = vsyncpa [#allocation7], 0 }
   0x2   :  { %16 = vsyncpa [#allocation5], 0  ;;  %s3800_s30 = smov [#allocation3]   ;;  %s3801_s11 = smov [#allocation6]  }
   0x3   :  { %s25_s10 = sshll.u32 %s3800_s30, 4  ;;  %s34_s12 = sshll.u32 %s3801_s11, 4  ;;  %s26_s10 = int_to_ptr.vmem [resolvable:$true] %s25_s10  ;;  %s3880_s12 = int_to_ptr.vmem [resolvable:$true] %s34_s12 }
   0x4   :  { %s3728_s15 = scalar_lea.hbm %s4614_s1, 256 }
   0x5   :  { %p3729_p0 = scmp.ne.s32.totalorder %s4614_s1, %s3728_s15  ;;  %p3732_p1 = scmp.lt.u32.totalorder %s3728_s15, %s4614_s1 }
   0x7   :  { %p3734_p2 = pnand %p3732_p1, %p3729_p0 }
   0x9   :  { %3737 = shalt.err (!%p3734_p2)
}
   0xa   :  { %s3738_s20 = scalar_lea.vmem %s26_s10, 256  ;;  %p3743_p4 = scmp.lt.s32.totalorder %s26_s10, %s26_s10 }
   0xb   :  { %p3739_p3 = scmp.ne.s32.totalorder %s26_s10, %s3738_s20  ;;  %p3744_p5 = scmp.lt.s32.totalorder %s3738_s20, %s3738_s20 }
   0xd   :  { %p3745_p6 = por %p3744_p5, %p3743_p4 }
   0xf   :  { %p3746_p7 = pnand %p3745_p6, %p3739_p3 }
  0x11   :  { %3749 = shalt.err (!%p3746_p7)
}
  0x12   :  { %28 = dma.hbm_to_vmem [thread:$0]  %s4614_s1, 256, %s26_s10, [#allocation4]  }
  0x13   :  { %s3750_s25 = scalar_lea.hbm %s4615_s2, 4096 }
  0x14   :  { %p3751_p8 = scmp.ne.s32.totalorder %s4615_s2, %s3750_s25  ;;  %p3754_p9 = scmp.lt.u32.totalorder %s3750_s25, %s4615_s2 }
  0x16   :  { %p3756_p10 = pnand %p3754_p9, %p3751_p8 }
  0x18   :  { %3759 = shalt.err (!%p3756_p10)
}
  0x19   :  { %s3760_s30 = scalar_lea.vmem %s3880_s12, 4096  ;;  %p3765_p12 = scmp.lt.s32.totalorder %s3880_s12, %s3880_s12 }
  0x1a   :  { %p3761_p11 = scmp.ne.s32.totalorder %s3880_s12, %s3760_s30  ;;  %p3766_p13 = scmp.lt.s32.totalorder %s3760_s30, %s3760_s30 }
  0x1c   :  { %p3767_p0 = por %p3766_p13, %p3765_p12 }
  0x1e   :  { %p3768_p1 = pnand %p3767_p0, %p3761_p11 }
  0x20   :  { %3771 = shalt.err (!%p3768_p1)
}
  0x21   :  { %s3802_s1 = smov 64   ;;  %s3803_s10 = smov 4  }
  0x22   :  { %40 = dma.hbm_to_vmem [thread:$0]  %s4615_s2, 4096, %s3880_s12, [#allocation7], %s3802_s1, %s3802_s1, %s3803_s10  }
  0x23   :  { %3794 = dma.done.wait [#allocation4], 256  }
  0x24   :  { %3795 = vsyncadd [#allocation4], 4294967040 }
  0x25   :  { %3796 = dma.done.wait [#allocation7], 4096  }
  0x26   :  { %3797 = vsyncadd [#allocation7], 4294963200  ;;  %v102_v0 = vlaneseq  ;;  %vm60_vm0 = vcmask 134144   ;;  %v3804_v1 = vmov 0.0   ;;  %vm62_vm1 = vcmask 273544   ;;  %v75_v7 = vld [vmem:[%s4613_s0] sm:$0xff] }
  0x27   :  { %61 = vst.msk [vmem:[#allocation2] sm:$0xf] %vm60_vm0, %v3804_v1  ;;  %v64_v8 = vld [vmem:[#allocation3] ss:$4 sm:$0xf]  ;;  %s3805_s14 = smov 17  }
  0x28   :  { %v3912_v2 = vshrl.u32 %v102_v0, 7  ;;  %63 = vst.msk [vmem:[#allocation2 + $0x10] sm:$0xf] %vm62_vm1, %v3804_v1  ;;  %79 = vrot.lane.b32.xlu0 %v75_v7, %s3805_s14  ;;  %v70_v13 = vld [vmem:[#allocation3 + $0x3] ss:$4 sm:$0xf] }
  0x29   :  { %v68_v14 = vld [vmem:[#allocation3 + $0x2] ss:$4 sm:$0xf]  ;;  %v76_v15 = vld [vmem:[%s4613_s0 + $0x8] sm:$0xff]  ;;  %v72_v16 = vmul.f32 %v70_v13, %v64_v8  ;;  %s3806_s17 = smov 1   ;;  %s3807_s0 = smov 2  }
  0x2a   :  { %v3915_v3 = vsub.s32 0, %v3912_v2  ;;  %v3918_v4 = vsub.s32 1, %v3912_v2  ;;  %v3921_v5 = vsub.s32 2, %v3912_v2  ;;  %v3924_v6 = vsub.s32 3, %v3912_v2  ;;  %s3808_s18 = smov 16   ;;  %s3809_s19 = smov 18  }
  0x2b   :  { %v66_v22 = vld [vmem:[#allocation3 + $0x1] ss:$4 sm:$0xf]  ;;  %v71_v37 = vmul.f32 %v68_v14, %v64_v8  ;;  %s3810_s20 = smov 32   ;;  %v3811_v60 = vmov 1983009808  }
  0x2c   :  { %v140_v9 = vrot.slane %v64_v8, %v3915_v3  ;;  %v144_v10 = vrot.slane %v64_v8, %v3918_v4  ;;  %v148_v11 = vrot.slane %v64_v8, %v3921_v5  ;;  %v152_v12 = vrot.slane %v64_v8, %v3924_v6  ;;  %81 = vrot.lane.b32.xlu0 %v76_v15, %s3805_s14  ;;  %s3812_s21 = smov 33   ;;  %s3813_s22 = smov 34  }
  0x2d   :  { %v415_v18 = vrot.slane %v72_v16, %v3915_v3  ;;  %v419_v19 = vrot.slane %v72_v16, %v3918_v4  ;;  %v596_v20 = vrot.slane %v68_v14, %v3915_v3  ;;  %v600_v21 = vrot.slane %v68_v14, %v3918_v4  ;;  %s3814_s25 = smov 124   ;;  %s3815_s28 = smov 120  }
  0x2e   :  { %v153_v17 = vcombine.low %v140_v9, %v144_v10  ;;  %v154_v23 = vcombine.low %v148_v11, %v152_v12  ;;  %v423_v24 = vrot.slane %v72_v16, %v3921_v5  ;;  %v427_v25 = vrot.slane %v72_v16, %v3924_v6  ;;  %s3816_s29 = smov 116   ;;  %s3818_s30 = smov 127  }
  0x2f   :  { %v428_v26 = vcombine.low %v415_v18, %v419_v19  ;;  %v609_v27 = vcombine.low %v596_v20, %v600_v21  ;;  %v604_v28 = vrot.slane %v68_v14, %v3921_v5  ;;  %v608_v29 = vrot.slane %v68_v14, %v3924_v6  ;;  %s3819_s1 = smov 126   ;;  %s3820_s10 = smov 112  }
  0x30   :  { %155 = vrot.lane.b32.xlu1 %v153_v17, %s3806_s17  ;;  %v923_v30 = vrot.slane %v70_v13, %v3915_v3  ;;  %v429_v31 = vcombine.low %v423_v24, %v427_v25  ;;  %v927_v32 = vrot.slane %v70_v13, %v3918_v4  ;;  %v73_v33 = vmul.f32 %v68_v14, %v66_v22  ;;  %s3822_s11 = smov 110   ;;  %s3823_s13 = smov 108  }
  0x31   :  { %430 = vrot.lane.b32.xlu0 %v428_v26, %s3807_s0  ;;  %v610_v34 = vcombine.low %v604_v28, %v608_v29  ;;  %v931_v35 = vrot.slane %v70_v13, %v3921_v5  ;;  %v935_v36 = vrot.slane %v70_v13, %v3924_v6  ;;  %v105_v41 = vrot.slane %v71_v37, %v3915_v3  ;;  %s3824_s2 = smov 96   ;;  %s3825_s12 = smov 104  }
  0x32   :  { %v936_v38 = vcombine.low %v923_v30, %v927_v32  ;;  %v1104_v39 = vrot.slane %v73_v33, %v3915_v3  ;;  %v1108_v40 = vrot.slane %v73_v33, %v3918_v4  ;;  %v109_v42 = vrot.slane %v71_v37, %v3918_v4  ;;  %s3826_s15 = smov 95   ;;  %s3827_s16 = smov 100  }
  0x33   :  { %v113_v43 = vrot.slane %v71_v37, %v3921_v5  ;;  %v1285_v44 = vrot.slane %v66_v22, %v3915_v3  ;;  %v1289_v45 = vrot.slane %v66_v22, %v3918_v4  ;;  %v117_v46 = vrot.slane %v71_v37, %v3924_v6 }
  0x34   :  { %157 = vrot.lane.b32.xlu1 %v154_v23, %s3806_s17  ;;  %v937_v47 = vcombine.low %v931_v35, %v935_v36  ;;  %v1112_v48 = vrot.slane %v73_v33, %v3921_v5  ;;  %v74_v49 = vmul.f32 %v70_v13, %v66_v22  ;;  %v3959_v50 = vcombine.low %v105_v41, %v109_v42  ;;  %s3828_s17 = smov 94  }
  0x35   :  { %611 = vrot.lane.b32.xlu0 %v609_v27, %s3808_s18  ;;  %v1117_v51 = vcombine.low %v1104_v39, %v1108_v40  ;;  %v1116_v52 = vrot.slane %v73_v33, %v3924_v6  ;;  %v3962_v53 = vcombine.low %v113_v43, %v117_v46  ;;  %v1298_v54 = vcombine.low %v1285_v44, %v1289_v45 }
  0x36   :  { %v1293_v55 = vrot.slane %v66_v22, %v3921_v5  ;;  %v1297_v56 = vrot.slane %v66_v22, %v3924_v6  ;;  %v1466_v58 = vrot.slane %v74_v49, %v3915_v3  ;;  %v1470_v59 = vrot.slane %v74_v49, %v3918_v4  ;;  %v3976_v4 = vld [vmem:[%s4616_s3] sm:$0x3] }
  0x37   :  { %v1118_v57 = vcombine.low %v1112_v48, %v1116_v52  ;;  %v184_v61 = vunpack.c.l.s4 %v3811_v60  ;;  %v1474_v0 = vrot.slane %v74_v49, %v3921_v5  ;;  %v1478_v1 = vrot.slane %v74_v49, %v3924_v6  ;;  %v3984_v5 = vld.sshfl [vmem:[%s4616_s3] sm:$0x3 pattern:$0x76325410]  ;;  %s3817_s3 = smov 111  }
  0x38   :  { %432 = vrot.lane.b32.xlu1 %v429_v31, %s3807_s0  ;;  %v1299_v62 = vcombine.low %v1293_v55, %v1297_v56  ;;  %v1479_v63 = vcombine.low %v1466_v58, %v1470_v59  ;;  %vm93_vm2 = vcmask 1043592   ;;  %vm94_vm3 = vcmask 1047556  }
  0x39   :  { %938 = vrot.lane.b32.xlu0 %v936_v38, %s3809_s19  ;;  %v185_v7 = vunpack.c.0.s8 %v184_v61  ;;  %v1480_v8 = vcombine.low %v1474_v0, %v1478_v1  ;;  %vm85_vm4 = vcmask 138240   ;;  %vm3990_vm5 = vmor %vm94_vm3, %vm93_vm2  ;;  %vm161_vm6 = vcmask 7168  }
  0x3a   :  { %vm436_vm7 = vcmask 15360   ;;  %vm617_vm8 = vcmask 130048   ;;  %vm87_vm9 = vcmask 1043456   ;;  %vm944_vm10 = vcmask 146432  }
  0x3b   :  { %v3971_v3 = vsub.s32 %v185_v7, %v3912_v2  ;;  %vm1125_vm11 = vcmask 261120   ;;  %vm1306_vm12 = vcmask 269312   ;;  %vm1487_vm13 = vcmask 277504  }
  0x3c   :  { %613 = vrot.lane.b32.xlu1 %v610_v34, %s3808_s18  ;;  %vm207_vm14 = vcmask 1039360   ;;  %vm216_vm15 = vcmask 1041408   ;;  %vm212_vm1 = vcmask 31744   ;;  %vm483_vm2 = vcmask 1031168  }
  0x3d   :  { %1119 = vrot.lane.b32.xlu0 %v1117_v51, %s3810_s20  ;;  %v189_v9 = vrot.slane %v3976_v4, %v3971_v3  ;;  %vm664_vm3 = vcmask 916480  }
  0x40   :  { %940 = vrot.lane.b32.xlu1 %v937_v47, %s3809_s19 }
  0x41   :  { %1300 = vrot.lane.b32.xlu0 %v1298_v54, %s3812_s21 }
  0x44   :  { %1121 = vrot.lane.b32.xlu1 %v1118_v57, %s3810_s20 }
  0x45   :  { %1481 = vrot.lane.b32.xlu0 %v1479_v63, %s3813_s22 }
  0x48   :  { %1302 = vrot.lane.b32.xlu1 %v1299_v62, %s3812_s21 }
  0x4c   :  { %1483 = vrot.lane.b32.xlu1 %v1480_v8, %s3813_s22 }
  0x50   :  { %190 = vrot.lane.b32.xlu1 %v189_v9, %s3814_s25 }
  0x54   :  { %466 = vrot.lane.b32.xlu1 %v3984_v5, %s3815_s28 }
  0x58   :  { %647 = vrot.lane.b32.xlu1 %v3984_v5, %s3816_s29 }
  0x9a   :  { %v80_v2 = vpop.permute.xlu0 %79 }
  0x9b   :  { %v83_v10 = vrot.slane %v80_v2, 4 }
  0x9d   :  { %v86_v11 = vsel %vm85_vm4, %v83_v10, %v80_v2 }
  0x9e   :  { %96 = vst.msk [vmem:[#allocation2] sm:$0xff] %vm3990_vm5, %v86_v11  ;;  %v82_v12 = vpop.permute.xlu0 %81 }
  0x9f   :  { %v84_v14 = vrot.slane %v82_v12, 4 }
  0xa1   :  { %98 = vst.msk [vmem:[#allocation2 + $0x10] sm:$0xf] %vm60_vm0, %v84_v14  ;;  %v88_v36 = vsel %vm87_vm9, %v83_v10, %v84_v14 }
  0xa2   :  { %v156_v13 = vpop.permute.xlu1 %155  ;;  %v4034_v45 = vsel %vm85_vm4, %v88_v36, %v82_v12  ;;  %v3821_v12 = vmov 0  }
  0xa3   :  { %v159_v15 = vrot.slane %v156_v13, 4  ;;  %v431_v17 = vpop.permute.xlu0 %430  ;;  %v777_v63 = vcombine.high %v4034_v45, %v4034_v45  ;;  %261 = vmatprep.mubr.bf16.mxu0 %v3821_v12  ;;  %302 = vmatprep.mubr.bf16.mxu1 %v3821_v12 }
  0xa4   :  { %v434_v18 = vrot.slane %v431_v17, 4  ;;  %3676 = vset.pattern.permute.xlu0 %v3821_v12  ;;  %3677 = vset.pattern.permute.xlu1 %v3821_v12 }
  0xa5   :  { %v4000_v20 = vld [vmem:[#allocation2] sm:$0xff]  ;;  %v4003_v21 = vsel %vm161_vm6, %v159_v15, %v156_v13  ;;  %v783_v9 = vpack.c.bf16 %v777_v63, %v777_v63 }
  0xa6   :  { %v158_v16 = vpop.permute.xlu1 %157  ;;  %v4006_v22 = vsel %vm436_vm7, %v434_v18, %v431_v17  ;;  %v168_v23 = vmul.f32 %v4003_v21, %v4000_v20  ;;  %v780_v29 = vpack.c.bf16 %v4000_v20, %v4000_v20  ;;  %v776_v58 = vcombine.high %v4000_v20, %v4000_v20 }
  0xa7   :  { %v3998_v19 = vrot.slane %v158_v16, 4  ;;  %v443_v24 = vmul.f32 %v4006_v22, %v4000_v20  ;;  %v612_v26 = vpop.permute.xlu0 %611 }
  0xa8   :  { %v615_v28 = vrot.slane %v612_v26, 4  ;;  %v173_v31 = vcombine.high %v168_v23, %v168_v23  ;;  %v135_v32 = vld [vmem:[#allocation2 + $0x10] sm:$0xf]  ;;  %800 = vrot.lane.b32.xlu0 %v780_v29, %s3817_s3  ;;  %v177_v59 = vpack.c.bf16 %v168_v23, %v168_v23  ;;  %v781_v62 = vpack.c.bf16 %v776_v58, %v776_v58 }
  0xa9   :  { %v163_v30 = vsel %vm87_vm9, %v159_v15, %v3998_v19  ;;  %v410_v33 = vld [vmem:[#allocation2 + $0x10] sm:$0xf]  ;;  %v170_v35 = vmul.f32 %v3998_v19, %v135_v32  ;;  %v449_v40 = vcombine.high %v443_v24, %v443_v24  ;;  %v453_v7 = vpack.c.bf16 %v443_v24, %v443_v24 }
  0xaa   :  { %v433_v25 = vpop.permute.xlu1 %432  ;;  %v4019_v34 = vsel %vm617_vm8, %v615_v28, %v612_v26  ;;  %v178_v39 = vpack.c.bf16 %v173_v31, %v173_v31  ;;  %v4027_v41 = vsel %vm161_vm6, %v163_v30, %v158_v16  ;;  %v591_v49 = vld [vmem:[#allocation2 + $0x10] sm:$0xf]  ;;  %vm810_vm6 = vcmask 908288  }
  0xab   :  { %v4012_v27 = vrot.slane %v433_v25, 4  ;;  %v624_v37 = vmul.f32 %v4019_v34, %v4000_v20  ;;  %v181_v43 = vpack.c.bf16 %v170_v35, %v170_v35  ;;  %v169_v46 = vmul.f32 %v4027_v41, %v4034_v45  ;;  %v939_v61 = vpop.permute.xlu0 %938 }
  0xac   :  { %199 = vrot.lane.b32.xlu1 %v178_v39, %s3818_s30  ;;  %v454_v47 = vpack.c.bf16 %v449_v40, %v449_v40  ;;  %v942_v1 = vrot.slane %v939_v61, 4  ;;  %v772_v40 = vld [vmem:[#allocation2 + $0x10] sm:$0xf] }
  0xad   :  { %v445_v44 = vmul.f32 %v4012_v27, %v410_v33  ;;  %205 = vrot.lane.b32.xlu0 %v181_v43, %s3818_s30  ;;  %v630_v48 = vcombine.high %v624_v37, %v624_v37  ;;  %v174_v55 = vcombine.high %v169_v46, %v169_v46  ;;  %v438_v60 = vsel %vm87_vm9, %v434_v18, %v4012_v27 }
  0xae   :  { %v614_v38 = vpop.permute.xlu1 %613  ;;  %v4053_v0 = vsel %vm436_vm7, %v438_v60, %v433_v25  ;;  %v4060_v2 = vsel %vm944_vm10, %v942_v1, %v939_v61  ;;  %v634_v10 = vpack.c.bf16 %v624_v37, %v624_v37  ;;  %v179_v16 = vpack.c.bf16 %v169_v46, %v169_v46  ;;  %v918_v60 = vld [vmem:[#allocation2 + $0x10] sm:$0xf] }
  0xaf   :  { %v4029_v42 = vrot.slane %v614_v38, 4  ;;  %v457_v51 = vpack.c.bf16 %v445_v44, %v445_v44  ;;  %v635_v54 = vpack.c.bf16 %v630_v48, %v630_v48  ;;  %v180_v57 = vpack.c.bf16 %v174_v55, %v174_v55  ;;  %v1120_v17 = vpop.permute.xlu0 %1119 }
  0xb0   :  { %475 = vrot.lane.b32.xlu1 %v454_v47, %s3819_s1  ;;  %v444_v8 = vmul.f32 %v4053_v0, %v4034_v45  ;;  %v951_v13 = vmul.f32 %v4060_v2, %v4000_v20  ;;  %v1123_v25 = vrot.slane %v1120_v17, 4  ;;  %v782_v37 = vpack.c.bf16 %v4034_v45, %v4034_v45 }
  0xb1   :  { %v626_v52 = vmul.f32 %v4029_v42, %v591_v49  ;;  %481 = vrot.lane.b32.xlu0 %v457_v51, %s3819_s1  ;;  %v619_v11 = vsel %vm87_vm9, %v615_v28, %v4029_v42  ;;  %v784_v48 = vpack.c.bf16 %v772_v40, %v772_v40  ;;  %vm991_vm7 = vcmask 900096  }
  0xb2   :  { %v450_v14 = vcombine.high %v444_v8, %v444_v8  ;;  %v4072_v15 = vsel %vm617_vm8, %v619_v11, %v614_v38  ;;  %v957_v24 = vcombine.high %v951_v13, %v951_v13  ;;  %v455_v26 = vpack.c.bf16 %v444_v8, %v444_v8  ;;  %v941_v28 = vpop.permute.xlu1 %940 }
  0xb3   :  { %v638_v56 = vpack.c.bf16 %v626_v52, %v626_v52  ;;  %v625_v18 = vmul.f32 %v4072_v15, %v4034_v45  ;;  %v4083_v31 = vsel %vm1125_vm11, %v1123_v25, %v1120_v17  ;;  %v4085_v33 = vrot.slane %v941_v28, 4  ;;  %v1301_v39 = vpop.permute.xlu0 %1300 }
  0xb4   :  { %656 = vrot.lane.b32.xlu1 %v635_v54, %s3820_s10  ;;  %v456_v23 = vpack.c.bf16 %v450_v14, %v450_v14  ;;  %v962_v29 = vpack.c.bf16 %v957_v24, %v957_v24  ;;  %v1132_v35 = vmul.f32 %v4083_v31, %v4000_v20  ;;  %v1304_v47 = vrot.slane %v1301_v39, 4 }
  0xb5   :  { %662 = vrot.lane.b32.xlu0 %v638_v56, %s3820_s10  ;;  %v631_v30 = vcombine.high %v625_v18, %v625_v18  ;;  %v636_v32 = vpack.c.bf16 %v625_v18, %v625_v18  ;;  %v946_v38 = vsel %vm87_vm9, %v942_v1, %v4085_v33  ;;  %v961_v55 = vpack.c.bf16 %v951_v13, %v951_v13 }
  0xb6   :  { %v1122_v43 = vpop.permute.xlu1 %1121  ;;  %v1138_v44 = vcombine.high %v1132_v35, %v1132_v35  ;;  %v4098_v46 = vsel %vm944_vm10, %v946_v38, %v941_v28  ;;  %v4108_v54 = vsel %vm1306_vm12, %v1304_v47, %v1301_v39  ;;  %v953_v63 = vmul.f32 %v4085_v33, %v918_v60 }
  0xb7   :  { %v637_v36 = vpack.c.bf16 %v631_v30, %v631_v30  ;;  %v4100_v49 = vrot.slane %v1122_v43, 4  ;;  %v952_v51 = vmul.f32 %v4098_v46, %v4034_v45  ;;  %v1313_v58 = vmul.f32 %v4108_v54, %v4000_v20  ;;  %v1482_v13 = vpop.permute.xlu0 %1481 }
  0xb8   :  { %203 = vrot.lane.b32.xlu1 %v180_v57, %s3818_s30  ;;  %v1143_v52 = vpack.c.bf16 %v1138_v44, %v1138_v44  ;;  %v1142_v24 = vpack.c.bf16 %v1132_v35, %v1132_v35  ;;  %vm1172_vm8 = vcmask 785408   ;;  %vm4624_vm10 = vcmask 777216  }
  0xb9   :  { %197 = vrot.lane.b32.xlu0 %v177_v59, %s3818_s30  ;;  %v1127_v56 = vsel %vm87_vm9, %v1123_v25, %v4100_v49  ;;  %v958_v59 = vcombine.high %v952_v51, %v952_v51 }
  0xba   :  { %v1303_v57 = vpop.permute.xlu1 %1302  ;;  %v4117_v61 = vsel %vm1125_vm11, %v1127_v56, %v1122_v43  ;;  %vm4623_vm11 = vcmask 769024  }
  0xbb   :  { %v4120_v1 = vrot.slane %v1303_v57, 4  ;;  %v964_v8 = vpack.c.bf16 %v958_v59, %v958_v59 }
  0xbc   :  { %802 = vrot.lane.b32.xlu1 %v781_v62, %s3817_s3  ;;  %v963_v62 = vpack.c.bf16 %v952_v51, %v952_v51 }
  0xbd   :  { %473 = vrot.lane.b32.xlu0 %v453_v7, %s3819_s1  ;;  %v1133_v7 = vmul.f32 %v4117_v61, %v4034_v45  ;;  %v1308_v11 = vsel %vm87_vm9, %v1304_v47, %v4120_v1 }
  0xbe   :  { %v1484_v14 = vpop.permute.xlu1 %1483  ;;  %v4132_v18 = vsel %vm1306_vm12, %v1308_v11, %v1303_v57 }
  0xbf   :  { %v1139_v17 = vcombine.high %v1133_v7, %v1133_v7  ;;  %v4134_v25 = vrot.slane %v1484_v14, 4 }
  0xc0   :  { %806 = vrot.lane.b32.xlu1 %v783_v9, %s3817_s3  ;;  %v1319_v9 = vcombine.high %v1313_v58, %v1313_v58 }
  0xc1   :  { %654 = vrot.lane.b32.xlu0 %v634_v10, %s3820_s10  ;;  %v965_v10 = vpack.c.bf16 %v953_v63, %v953_v63  ;;  %v1145_v28 = vpack.c.bf16 %v1139_v17, %v1139_v17 }
  0xc4   :  { %793 = vrot.lane.b32.xlu1 %v3984_v5, %s3820_s10 }
  0xc5   :  { %201 = vrot.lane.b32.xlu0 %v179_v16, %s3818_s30  ;;  %v1324_v16 = vpack.c.bf16 %v1319_v9, %v1319_v9  ;;  %v1640_v9 = vld [vmem:[%s4617_s4] sm:$0xf] }
  0xc8   :  { %479 = vrot.lane.b32.xlu1 %v456_v23, %s3819_s1  ;;  %v1485_v23 = vrot.slane %v1482_v13, 4 }
  0xc9   :  { %477 = vrot.lane.b32.xlu0 %v455_v26, %s3819_s1  ;;  %v1314_v26 = vmul.f32 %v4132_v18, %v4034_v45 }
  0xca   :  { %v4141_v30 = vsel %vm1487_vm13, %v1485_v23, %v1482_v13  ;;  %v1489_v35 = vsel %vm87_vm9, %v1485_v23, %v4134_v25 }
  0xcb   :  { %v1320_v38 = vcombine.high %v1314_v26, %v1314_v26  ;;  %v4151_v39 = vsel %vm1487_vm13, %v1489_v35, %v1484_v14  ;;  %v1325_v56 = vpack.c.bf16 %v1314_v26, %v1314_v26 }
  0xcc   :  { %983 = vrot.lane.b32.xlu1 %v962_v29, %s3822_s11  ;;  %v1099_v29 = vld [vmem:[#allocation2 + $0x10] sm:$0xf]  ;;  %v1495_v43 = vmul.f32 %v4151_v39, %v4034_v45 }
  0xcd   :  { %658 = vrot.lane.b32.xlu0 %v636_v32, %s3820_s10  ;;  %v1144_v32 = vpack.c.bf16 %v1133_v7, %v1133_v7  ;;  %v1326_v44 = vpack.c.bf16 %v1320_v38, %v1320_v38  ;;  %v122_v38 = vmul.f32 %v3959_v50, %v4000_v20 }
  0xce   :  { %v1506_v63 = vpack.c.bf16 %v1495_v43, %v1495_v43 }
  0xd0   :  { %660 = vrot.lane.b32.xlu1 %v637_v36, %s3820_s10  ;;  %v1134_v36 = vmul.f32 %v4100_v49, %v1099_v29 }
  0xd1   :  { %804 = vrot.lane.b32.xlu0 %v782_v37, %s3817_s3  ;;  %v1494_v37 = vmul.f32 %v4141_v30, %v4000_v20 }
  0xd2   :  { %v1146_v40 = vpack.c.bf16 %v1134_v36, %v1134_v36 }
  0xd3   :  { %v1500_v47 = vcombine.high %v1494_v37, %v1494_v37 }
  0xd4   :  { %974 = vrot.lane.b32.xlu1 %v3984_v5, %s3823_s13 }
  0xd5   :  { %808 = vrot.lane.b32.xlu0 %v784_v48, %s3817_s3  ;;  %v1323_v48 = vpack.c.bf16 %v1313_v58, %v1313_v58  ;;  %v1505_v51 = vpack.c.bf16 %v1500_v47, %v1500_v47  ;;  %v1504_v58 = vpack.c.bf16 %v1494_v37, %v1494_v37  ;;  %v123_v37 = vmul.f32 %v3962_v53, %v4034_v45 }
  0xd6   :  { %v127_v47 = vcombine.high %v122_v38, %v122_v38 }
  0xd8   :  { %1164 = vrot.lane.b32.xlu1 %v1143_v52, %s3824_s2  ;;  %v1501_v52 = vcombine.high %v1495_v43, %v1495_v43 }
  0xd9   :  { %981 = vrot.lane.b32.xlu0 %v961_v55, %s3822_s11  ;;  %v1280_v55 = vld [vmem:[#allocation2 + $0x10] sm:$0xf] }
  0xda   :  { %v1315_v57 = vmul.f32 %v4120_v1, %v1280_v55  ;;  %v1507_v59 = vpack.c.bf16 %v1501_v52, %v1501_v52 }
  0xdc   :  { %1155 = vrot.lane.b32.xlu1 %v3984_v5, %s3825_s12  ;;  %v1327_v60 = vpack.c.bf16 %v1315_v57, %v1315_v57 }
  0xdd   :  { %985 = vrot.lane.b32.xlu0 %v963_v62, %s3822_s11  ;;  %v1461_v62 = vld [vmem:[#allocation2 + $0x10] sm:$0xf] }
  0xde   :  { %v1496_v7 = vmul.f32 %v4134_v25, %v1461_v62 }
  0xe0   :  { %987 = vrot.lane.b32.xlu1 %v964_v8, %s3822_s11  ;;  %v1508_v8 = vpack.c.bf16 %v1496_v7, %v1496_v7 }
  0xe1   :  { %989 = vrot.lane.b32.xlu0 %v965_v10, %s3822_s11  ;;  %v191_v10 = vpop.permute.xlu1 %190 }
  0xe4   :  { %1345 = vrot.lane.b32.xlu1 %v1324_v16, %s3826_s15 }
  0xe5   :  { %1162 = vrot.lane.b32.xlu0 %v1142_v24, %s3824_s2  ;;  %v4174_v11 = vpop.permute.xlu1 %466 }
  0xe8   :  { %1168 = vrot.lane.b32.xlu1 %v1145_v28, %s3824_s2 }
  0xe9   :  { %1166 = vrot.lane.b32.xlu0 %v1144_v32, %s3824_s2 }
  0xec   :  { %1336 = vrot.lane.b32.xlu1 %v3984_v5, %s3827_s16 }
  0xed   :  { %1170 = vrot.lane.b32.xlu0 %v1146_v40, %s3824_s2 }
  0xf0   :  { %1349 = vrot.lane.b32.xlu1 %v1326_v44, %s3826_s15  ;;  %v128_v44 = vcombine.high %v123_v37, %v123_v37 }
  0xf1   :  { %1343 = vrot.lane.b32.xlu0 %v1323_v48, %s3826_s15 }
  0xf2   :  { %v134_v57 = vpack.c.bf16 %v128_v44, %v128_v44 }
  0xf4   :  { %1526 = vrot.lane.b32.xlu1 %v1505_v51, %s3828_s17 }
  0xf5   :  { %1347 = vrot.lane.b32.xlu0 %v1325_v56, %s3826_s15 }
  0xf8   :  { %1530 = vrot.lane.b32.xlu1 %v1507_v59, %s3828_s17  ;;  %v133_v59 = vpack.c.bf16 %v123_v37, %v123_v37 }
  0xf9   :  { %1351 = vrot.lane.b32.xlu0 %v1327_v60, %s3826_s15  ;;  %v132_v60 = vpack.c.bf16 %v127_v47, %v127_v47 }
  0xfa   :  { %v321_v7 = vsel %vm216_vm15, %v133_v59, 0 }
  0xfc   :  { %1517 = vrot.lane.b32.xlu1 %v3984_v5, %s3824_s2  ;;  %v4176_v5 = vpop.permute.xlu1 %647 }
  0xfd   :  { %1524 = vrot.lane.b32.xlu0 %v1504_v58, %s3828_s17  ;;  %v131_v58 = vpack.c.bf16 %v122_v38, %v122_v38 }
 0x101   :  { %1528 = vrot.lane.b32.xlu0 %v1506_v63, %s3828_s17 }
 0x105   :  { %1532 = vrot.lane.b32.xlu0 %v1508_v8, %s3828_s17  ;;  %v315_v8 = vsel %vm216_vm15, %v131_v58, 0 }
 0x109   :  { %1643 = vperm.xlu0 %3676, %v1640_v9  }
 0x11a   :  { %v4178_v13 = vpop.permute.xlu0 %800 }
 0x11e   :  { %v200_v14 = vpop.permute.xlu1 %199 }
 0x11f   :  { %v206_v16 = vpop.permute.xlu0 %205 }
 0x122   :  { %v476_v17 = vpop.permute.xlu1 %475 }
 0x123   :  { %v482_v23 = vpop.permute.xlu0 %481 }
 0x126   :  { %v4180_v24 = vpop.permute.xlu1 %656 }
 0x127   :  { %v663_v26 = vpop.permute.xlu0 %662 }
 0x12a   :  { %v204_v28 = vpop.permute.xlu1 %203 }
 0x12b   :  { %v198_v29 = vpop.permute.xlu0 %197  ;;  %v211_v32 = vsel %vm207_vm14, %v204_v28, %v206_v16 }
 0x12c   :  { %3474 = vmatprep.subr.msk.bf16.mxu1 %vm216_vm15, %v211_v32  ;;  %v208_v51 = vsel %vm207_vm14, %v198_v29, %v200_v14 }
 0x12d   :  { %v218_v20 = vsel %vm216_vm15, %v208_v51, 0 }
 0x12e   :  { %v4184_v36 = vpop.permute.xlu1 %802 }
 0x12f   :  { %v474_v35 = vpop.permute.xlu0 %473 }
 0x132   :  { %v4190_v40 = vpop.permute.xlu1 %806 }
 0x133   :  { %v655_v43 = vpop.permute.xlu0 %654 }
 0x136   :  { %v4192_v48 = vpop.permute.xlu1 %793 }
 0x137   :  { %v202_v52 = vpop.permute.xlu0 %201 }
 0x138   :  { %v209_v55 = vsel %vm207_vm14, %v200_v14, %v202_v52  ;;  %v210_v56 = vsel %vm207_vm14, %v202_v52, %v204_v28 }
 0x139   :  { %3472 = vmatprep.subr.msk.bf16.mxu0 %vm216_vm15, %v209_v55  ;;  %v224_v45 = vsel %vm216_vm15, %v210_v56, 0 }
 0x13a   :  { %230 = vmatpush1.bf16.msra.mxu0 %v218_v20  ;;  %271 = vmatpush1.bf16.msra.mxu1 %v224_v45  ;;  %v480_v62 = vpop.permute.xlu1 %479 }
 0x13b   :  { %v478_v63 = vpop.permute.xlu0 %477  ;;  %3476 = vmatprep.subr.msk.bf16.mxu0 %vm216_vm15, %v132_v60  ;;  %3478 = vmatprep.subr.msk.bf16.mxu1 %vm216_vm15, %v134_v57  ;;  %v487_v9 = vsel %vm483_vm2, %v480_v62, %v482_v23 }
 0x13c   :  { %v485_v14 = vsel %vm483_vm2, %v476_v17, %v478_v63  ;;  %v486_v29 = vsel %vm483_vm2, %v478_v63, %v480_v62 }
 0x13d   :  { %3473 = vmatmul.mubr.msk.bf16.vlgmr.msra.gmra.mrb[0].mxu0 %vm212_vm1, %v191_v10  ;;  %3475 = vmatmul.mubr.msk.bf16.vlgmr.msra.gmra.mrb[0].mxu1 %vm212_vm1, %v191_v10  ;;  %v484_v10 = vsel %vm483_vm2, %v474_v35, %v476_v17  ;;  %v498_v38 = vsel %vm216_vm15, %v486_v29, 0 }
 0x13e   :  { %368 = vmatpush1.bf16.msra.mxu1 %v321_v7  ;;  %v4208_v16 = vpop.permute.xlu1 %983  ;;  %327 = vmatpush1.bf16.msra.mxu0 %v315_v8  ;;  %v492_v37 = vsel %vm216_vm15, %v484_v10, 0 }
 0x13f   :  { %v659_v28 = vpop.permute.xlu0 %658  ;;  %3481 = vmatprep.subr.msk.bf16.mxu0 %vm216_vm15, %v485_v14  ;;  %3483 = vmatprep.subr.msk.bf16.mxu1 %vm216_vm15, %v487_v9 }
 0x140   :  { %358 = vmatprep.mubr.bf16.mxu0 %v3821_v12  ;;  %399 = vmatprep.mubr.bf16.mxu1 %v3821_v12  ;;  %v666_v44 = vsel %vm664_vm3, %v4180_v24, %v659_v28 }
 0x142   :  { %v661_v23 = vpop.permute.xlu1 %660 }
 0x143   :  { %v805_v32 = vpop.permute.xlu0 %804  ;;  %v668_v17 = vsel %vm664_vm3, %v661_v23, %v663_v26  ;;  %v667_v51 = vsel %vm664_vm3, %v659_v28, %v661_v23 }
 0x144   :  { %v679_v56 = vsel %vm216_vm15, %v667_v51, 0  ;;  %v812_v57 = vsel %vm810_vm6, %v4184_v36, %v805_v32  ;;  %v813_v20 = vsel %vm810_vm6, %v805_v32, %v4190_v40 }
 0x145   :  { %3477 = vmatmul.mubr.msk.bf16.vlgmr.msra.gmra.mrb[4].mxu0 %vm212_vm1, %v3976_v4  ;;  %3479 = vmatmul.mubr.msk.bf16.vlgmr.msra.gmra.mrb[4].mxu1 %vm212_vm1, %v3976_v4  ;;  %v665_v4 = vsel %vm664_vm3, %v655_v43, %v4180_v24  ;;  %v825_v63 = vsel %vm216_vm15, %v813_v20, 0 }
 0x146   :  { %504 = vmatpush1.bf16.msra.mxu0 %v492_v37  ;;  %545 = vmatpush1.bf16.msra.mxu1 %v498_v38  ;;  %v4225_v35 = vpop.permute.xlu1 %974  ;;  %v673_v55 = vsel %vm216_vm15, %v665_v4, 0 }
 0x147   :  { %3488 = vmatprep.subr.msk.bf16.mxu1 %vm216_vm15, %v668_v17  ;;  %3486 = vmatprep.subr.msk.bf16.mxu0 %vm216_vm15, %v666_v44  ;;  %v809_v47 = vpop.permute.xlu0 %808 }
 0x148   :  { %535 = vmatprep.mubr.bf16.mxu0 %v3821_v12  ;;  %576 = vmatprep.mubr.bf16.mxu1 %v3821_v12  ;;  %v814_v24 = vsel %vm810_vm6, %v4190_v40, %v809_v47 }
 0x14a   :  { %v1165_v52 = vpop.permute.xlu1 %1164 }
 0x14b   :  { %v982_v26 = vpop.permute.xlu0 %981 }
 0x14c   :  { %v992_v7 = vsel %vm991_vm7, %v982_v26, %v4208_v16 }
 0x14d   :  { %3482 = vmatmul.mubr.msk.bf16.vlgmr.msra.gmra.mrb[8].mxu0 %vm212_vm1, %v4174_v11  ;;  %3484 = vmatmul.mubr.msk.bf16.vlgmr.msra.gmra.mrb[8].mxu1 %vm212_vm1, %v4174_v11  ;;  %v811_v11 = vsel %vm810_vm6, %v4178_v13, %v4184_v36  ;;  %v1000_v14 = vsel %vm216_vm15, %v992_v7, 0 }
 0x14e   :  { %685 = vmatpush1.bf16.msra.mxu0 %v673_v55  ;;  %726 = vmatpush1.bf16.msra.mxu1 %v679_v56  ;;  %v4244_v43 = vpop.permute.xlu1 %1155  ;;  %v819_v62 = vsel %vm216_vm15, %v811_v11, 0 }
 0x14f   :  { %3493 = vmatprep.subr.msk.bf16.mxu1 %vm216_vm15, %v814_v24  ;;  %3491 = vmatprep.subr.msk.bf16.mxu0 %vm216_vm15, %v812_v57  ;;  %v986_v59 = vpop.permute.xlu0 %985 }
 0x150   :  { %716 = vmatprep.mubr.bf16.mxu0 %v3821_v12  ;;  %757 = vmatprep.mubr.bf16.mxu1 %v3821_v12  ;;  %v993_v13 = vsel %vm991_vm7, %v4208_v16, %v986_v59 }
 0x152   :  { %v988_v45 = vpop.permute.xlu1 %987 }
 0x153   :  { %v990_v60 = vpop.permute.xlu0 %989 }
 0x154   :  { %v995_v58 = vsel %vm991_vm7, %v988_v45, %v990_v60 }
 0x155   :  { %3487 = vmatmul.mubr.msk.bf16.vlgmr.msra.gmra.mrb[12].mxu0 %vm212_vm1, %v4176_v5  ;;  %3489 = vmatmul.mubr.msk.bf16.vlgmr.msra.gmra.mrb[12].mxu1 %vm212_vm1, %v4176_v5  ;;  %v994_v5 = vsel %vm991_vm7, %v986_v59, %v988_v45 }
 0x156   :  { %831 = vmatpush1.bf16.msra.mxu0 %v819_v62  ;;  %872 = vmatpush1.bf16.msra.mxu1 %v825_v63  ;;  %v1346_v36 = vpop.permute.xlu1 %1345  ;;  %v1006_v28 = vsel %vm216_vm15, %v994_v5, 0 }
 0x157   :  { %3498 = vmatprep.subr.msk.bf16.mxu1 %vm216_vm15, %v995_v58  ;;  %3496 = vmatprep.subr.msk.bf16.mxu0 %vm216_vm15, %v993_v13  ;;  %v1163_v40 = vpop.permute.xlu0 %1162 }
 0x158   :  { %862 = vmatprep.mubr.bf16.mxu0 %v3821_v12  ;;  %903 = vmatprep.mubr.bf16.mxu1 %v3821_v12  ;;  %v1173_v23 = vsel %vm1172_vm8, %v1163_v40, %v1165_v52 }
 0x15a   :  { %v1169_v10 = vpop.permute.xlu1 %1168 }
 0x15b   :  { %v1167_v8 = vpop.permute.xlu0 %1166 }
 0x15c   :  { %v1174_v9 = vsel %vm1172_vm8, %v1165_v52, %v1167_v8  ;;  %v1175_v32 = vsel %vm1172_vm8, %v1167_v8, %v1169_v10 }
 0x15d   :  { %3492 = vmatmul.mubr.msk.bf16.vlgmr.msra.gmra.mrb[16].mxu0 %vm212_vm1, %v4192_v48  ;;  %3494 = vmatmul.mubr.msk.bf16.vlgmr.msra.gmra.mrb[16].mxu1 %vm212_vm1, %v4192_v48  ;;  %v1181_v48 = vsel %vm216_vm15, %v1173_v23, 0  ;;  %v1187_v44 = vsel %vm216_vm15, %v1175_v32, 0 }
 0x15e   :  { %1012 = vmatpush1.bf16.msra.mxu0 %v1000_v14  ;;  %1053 = vmatpush1.bf16.msra.mxu1 %v1006_v28  ;;  %v1337_v37 = vpop.permute.xlu1 %1336 }
 0x15f   :  { %3501 = vmatprep.subr.msk.bf16.mxu0 %vm216_vm15, %v1174_v9  ;;  %v1171_v16 = vpop.permute.xlu0 %1170  ;;  %1043 = vmatprep.mubr.bf16.mxu0 %v3821_v12 }
 0x160   :  { %v1176_v29 = vsel %vm1172_vm8, %v1169_v10, %v1171_v16  ;;  %1084 = vmatprep.mubr.bf16.mxu1 %v3821_v12 }
 0x161   :  { %3503 = vmatprep.subr.msk.bf16.mxu1 %vm216_vm15, %v1176_v29 }
 0x162   :  { %v1350_v4 = vpop.permute.xlu1 %1349 }
 0x163   :  { %v1344_v38 = vpop.permute.xlu0 %1343 }
 0x164   :  { %v1354_v51 = vsel %vm4624_vm10, %v1344_v38, %v1346_v36 }
 0x165   :  { %3497 = vmatmul.mubr.msk.bf16.vlgmr.msra.gmra.mrb[20].mxu0 %vm212_vm1, %v4225_v35  ;;  %3499 = vmatmul.mubr.msk.bf16.vlgmr.msra.gmra.mrb[20].mxu1 %vm212_vm1, %v4225_v35  ;;  %v1362_v55 = vsel %vm216_vm15, %v1354_v51, 0 }
 0x166   :  { %1193 = vmatpush1.bf16.msra.mxu0 %v1181_v48  ;;  %1234 = vmatpush1.bf16.msra.mxu1 %v1187_v44  ;;  %v1527_v57 = vpop.permute.xlu1 %1526 }
 0x167   :  { %v1348_v17 = vpop.permute.xlu0 %1347  ;;  %1224 = vmatprep.mubr.bf16.mxu0 %v3821_v12  ;;  %1265 = vmatprep.mubr.bf16.mxu1 %v3821_v12 }
 0x168   :  { %v1355_v47 = vsel %vm4624_vm10, %v1346_v36, %v1348_v17  ;;  %v1356_v52 = vsel %vm4624_vm10, %v1348_v17, %v1350_v4 }
 0x169   :  { %3506 = vmatprep.subr.msk.bf16.mxu0 %vm216_vm15, %v1355_v47  ;;  %v1368_v56 = vsel %vm216_vm15, %v1356_v52, 0 }
 0x16a   :  { %v1531_v45 = vpop.permute.xlu1 %1530 }
 0x16b   :  { %v1352_v26 = vpop.permute.xlu0 %1351 }
 0x16c   :  { %v1357_v35 = vsel %vm4624_vm10, %v1350_v4, %v1352_v26 }
 0x16d   :  { %3502 = vmatmul.mubr.msk.bf16.vlgmr.msra.gmra.mrb[24].mxu0 %vm212_vm1, %v4244_v43  ;;  %3504 = vmatmul.mubr.msk.bf16.vlgmr.msra.gmra.mrb[24].mxu1 %vm212_vm1, %v4244_v43 }
 0x16e   :  { %1374 = vmatpush1.bf16.msra.mxu0 %v1362_v55  ;;  %3508 = vmatprep.subr.msk.bf16.mxu1 %vm216_vm15, %v1357_v35  ;;  %v1518_v13 = vpop.permute.xlu1 %1517 }
 0x16f   :  { %1415 = vmatpush1.bf16.msra.mxu1 %v1368_v56  ;;  %v1525_v24 = vpop.permute.xlu0 %1524  ;;  %1405 = vmatprep.mubr.bf16.mxu0 %v3821_v12 }
 0x170   :  { %1446 = vmatprep.mubr.bf16.mxu1 %v3821_v12  ;;  %v1535_v59 = vsel %vm4623_vm11, %v1525_v24, %v1527_v57 }
 0x171   :  { %v1543_v43 = vsel %vm216_vm15, %v1535_v59, 0 }
 0x173   :  { %v1529_v11 = vpop.permute.xlu0 %1528 }
 0x174   :  { %v1536_v20 = vsel %vm4623_vm11, %v1527_v57, %v1529_v11  ;;  %v1537_v60 = vsel %vm4623_vm11, %v1529_v11, %v1531_v45 }
 0x175   :  { %3507 = vmatmul.mubr.msk.bf16.vlgmr.msra.gmra.mrb[28].mxu0 %vm212_vm1, %v1337_v37  ;;  %3509 = vmatmul.mubr.msk.bf16.vlgmr.msra.gmra.mrb[28].mxu1 %vm212_vm1, %v1337_v37  ;;  %v1549_v63 = vsel %vm216_vm15, %v1537_v60, 0 }
 0x176   :  { %3511 = vmatprep.subr.msk.bf16.mxu0 %vm216_vm15, %v1536_v20  ;;  %1627 = vmatprep.mubr.bf16.mxu1 %v3821_v12 }
 0x177   :  { %1555 = vmatpush1.bf16.msra.mxu0 %v1543_v43  ;;  %v1533_v58 = vpop.permute.xlu0 %1532  ;;  %1586 = vmatprep.mubr.bf16.mxu0 %v3821_v12 }
 0x178   :  { %v1538_v62 = vsel %vm4623_vm11, %v1531_v45, %v1533_v58 }
 0x179   :  { %3513 = vmatprep.subr.msk.bf16.mxu1 %vm216_vm15, %v1538_v62 }
 0x17a   :  { %1596 = vmatpush1.bf16.msra.mxu1 %v1549_v63 }
 0x17d   :  { %3512 = vmatmul.mubr.msk.bf16.vlgmr.msra.gmra.mrb[32].mxu0 %vm212_vm1, %v1518_v13  ;;  %3514 = vmatmul.mubr.msk.bf16.vlgmr.msra.gmra.mrb[32].mxu1 %vm212_vm1, %v1518_v13 }
 0x17e   :  { %1797 = vmatprep.mubr.bf16.mxu0 %v3821_v12  ;;  %1838 = vmatprep.mubr.bf16.mxu1 %v3821_v12 }
 0x210   :  { %v263_v36 = vpop.f32.mrb[0].mxu0  ;;  %v304_v40 = vpop.f32.mrb[0].mxu1 }
 0x211   :  { %v265_v7 = vpop.f32.mrb[1].mxu0  ;;  %v306_v5 = vpop.f32.mrb[1].mxu1 }
 0x212   :  { %v267_v8 = vpop.f32.mrb[2].mxu0  ;;  %v308_v9 = vpop.f32.mrb[2].mxu1 }
 0x213   :  { %v268_v14 = vpop.f32.mrb[3].mxu0  ;;  %v309_v28 = vpop.f32.mrb[3].mxu1 }
 0x218   :  { %v360_v10 = vpop.f32.mrb[4].mxu0  ;;  %v401_v16 = vpop.f32.mrb[4].mxu1 }
 0x219   :  { %v361_v29 = vadd.f32 %v360_v10, %v263_v36  ;;  %v402_v23 = vadd.f32 %v401_v16, %v304_v40  ;;  %v362_v32 = vpop.f32.mrb[5].mxu0  ;;  %v403_v37 = vpop.f32.mrb[5].mxu1 }
 0x21a   :  { %v363_v38 = vadd.f32 %v362_v32, %v265_v7  ;;  %v404_v48 = vadd.f32 %v403_v37, %v306_v5  ;;  %v364_v44 = vpop.f32.mrb[6].mxu0  ;;  %v405_v17 = vpop.f32.mrb[6].mxu1 }
 0x21b   :  { %v365_v47 = vpop.f32.mrb[7].mxu0  ;;  %v406_v4 = vpop.f32.mrb[7].mxu1 }
 0x220   :  { %v537_v51 = vpop.f32.mrb[8].mxu0  ;;  %v578_v52 = vpop.f32.mrb[8].mxu1 }
 0x221   :  { %v585_v26 = vadd.f32 %v537_v51, %v361_v29  ;;  %v587_v35 = vadd.f32 %v578_v52, %v402_v23  ;;  %v539_v55 = vpop.f32.mrb[9].mxu0  ;;  %v580_v56 = vpop.f32.mrb[9].mxu1 }
 0x222   :  { %v586_v57 = vadd.f32 %v539_v55, %v363_v38  ;;  %v588_v24 = vadd.f32 %v580_v56, %v404_v48  ;;  %v541_v59 = vpop.f32.mrb[10].mxu0  ;;  %v582_v11 = vpop.f32.mrb[10].mxu1 }
 0x223   :  { %v542_v20 = vpop.f32.mrb[11].mxu0  ;;  %v583_v45 = vpop.f32.mrb[11].mxu1 }
 0x228   :  { %v718_v43 = vpop.f32.mrb[12].mxu0  ;;  %v759_v60 = vpop.f32.mrb[12].mxu1 }
 0x229   :  { %v766_v58 = vadd.f32 %v718_v43, %v585_v26  ;;  %v768_v62 = vadd.f32 %v759_v60, %v587_v35  ;;  %v720_v63 = vpop.f32.mrb[13].mxu0  ;;  %v761_v13 = vpop.f32.mrb[13].mxu1 }
 0x22a   :  { %v767_v36 = vadd.f32 %v720_v63, %v586_v57  ;;  %v769_v40 = vadd.f32 %v761_v13, %v588_v24  ;;  %v722_v7 = vpop.f32.mrb[14].mxu0  ;;  %v763_v5 = vpop.f32.mrb[14].mxu1 }
 0x22b   :  { %v723_v8 = vpop.f32.mrb[15].mxu0  ;;  %v764_v9 = vpop.f32.mrb[15].mxu1 }
 0x230   :  { %v864_v14 = vpop.f32.mrb[16].mxu0  ;;  %v905_v28 = vpop.f32.mrb[16].mxu1 }
 0x231   :  { %v912_v10 = vadd.f32 %v864_v14, %v766_v58  ;;  %v914_v16 = vadd.f32 %v905_v28, %v768_v62  ;;  %v866_v29 = vpop.f32.mrb[17].mxu0  ;;  %v907_v23 = vpop.f32.mrb[17].mxu1 }
 0x232   :  { %v913_v32 = vadd.f32 %v866_v29, %v767_v36  ;;  %v915_v37 = vadd.f32 %v907_v23, %v769_v40  ;;  %v868_v38 = vpop.f32.mrb[18].mxu0  ;;  %v909_v48 = vpop.f32.mrb[18].mxu1 }
 0x233   :  { %v869_v44 = vpop.f32.mrb[19].mxu0  ;;  %v910_v17 = vpop.f32.mrb[19].mxu1 }
 0x234   :  { %v1644_v44 = vpop.permute.xlu0 %1643 }
 0x238   :  { %v1045_v47 = vpop.f32.mrb[20].mxu0  ;;  %v1086_v4 = vpop.f32.mrb[20].mxu1 }
 0x239   :  { %v1093_v51 = vadd.f32 %v1045_v47, %v912_v10  ;;  %v1095_v52 = vadd.f32 %v1086_v4, %v914_v16  ;;  %v1047_v26 = vpop.f32.mrb[21].mxu0  ;;  %v1088_v35 = vpop.f32.mrb[21].mxu1 }
 0x23a   :  { %v1094_v55 = vadd.f32 %v1047_v26, %v913_v32  ;;  %v1096_v56 = vadd.f32 %v1088_v35, %v915_v37  ;;  %v1049_v57 = vpop.f32.mrb[22].mxu0  ;;  %v1090_v24 = vpop.f32.mrb[22].mxu1 }
 0x23b   :  { %v1050_v59 = vpop.f32.mrb[23].mxu0  ;;  %v1091_v11 = vpop.f32.mrb[23].mxu1 }
 0x240   :  { %v1226_v20 = vpop.f32.mrb[24].mxu0  ;;  %v1267_v45 = vpop.f32.mrb[24].mxu1 }
 0x241   :  { %v1274_v43 = vadd.f32 %v1226_v20, %v1093_v51  ;;  %v1276_v60 = vadd.f32 %v1267_v45, %v1095_v52  ;;  %v1228_v58 = vpop.f32.mrb[25].mxu0  ;;  %v1269_v62 = vpop.f32.mrb[25].mxu1 }
 0x242   :  { %v1275_v63 = vadd.f32 %v1228_v58, %v1094_v55  ;;  %v1277_v13 = vadd.f32 %v1269_v62, %v1096_v56  ;;  %v1230_v36 = vpop.f32.mrb[26].mxu0  ;;  %v1271_v40 = vpop.f32.mrb[26].mxu1 }
 0x243   :  { %v1231_v7 = vpop.f32.mrb[27].mxu0  ;;  %v1272_v5 = vpop.f32.mrb[27].mxu1 }
 0x248   :  { %v1407_v8 = vpop.f32.mrb[28].mxu0  ;;  %v1448_v9 = vpop.f32.mrb[28].mxu1 }
 0x249   :  { %v1455_v14 = vadd.f32 %v1407_v8, %v1274_v43  ;;  %v1457_v28 = vadd.f32 %v1448_v9, %v1276_v60  ;;  %v1409_v10 = vpop.f32.mrb[29].mxu0  ;;  %v1450_v16 = vpop.f32.mrb[29].mxu1 }
 0x24a   :  { %v1456_v29 = vadd.f32 %v1409_v10, %v1275_v63  ;;  %v1458_v23 = vadd.f32 %v1450_v16, %v1277_v13  ;;  %v1411_v32 = vpop.f32.mrb[30].mxu0  ;;  %v1452_v37 = vpop.f32.mrb[30].mxu1 }
 0x24b   :  { %v1412_v38 = vpop.f32.mrb[31].mxu0  ;;  %v1453_v48 = vpop.f32.mrb[31].mxu1  ;;  %v4327_v37 = vld [vmem:[%s4618_s5] sm:$0x3] }
 0x24c   :  { %v1728_v38 = vrot.slane %v4327_v37, %v3971_v3  ;;  %v4336_v48 = vld.sshfl [vmem:[%s4618_s5] sm:$0x3 pattern:$0x76325410] }
 0x250   :  { %v1588_v17 = vpop.f32.mrb[32].mxu0  ;;  %v1629_v47 = vpop.f32.mrb[32].mxu1 }
 0x251   :  { %v1636_v4 = vadd.f32 %v1588_v17, %v1455_v14  ;;  %v1638_v51 = vadd.f32 %v1629_v47, %v1457_v28  ;;  %v1590_v52 = vpop.f32.mrb[33].mxu0  ;;  %v1631_v26 = vpop.f32.mrb[33].mxu1 }
 0x252   :  { %v1637_v35 = vadd.f32 %v1590_v52, %v1456_v29  ;;  %v1639_v55 = vadd.f32 %v1631_v26, %v1458_v23  ;;  %v1592_v56 = vpop.f32.mrb[34].mxu0  ;;  %v1633_v57 = vpop.f32.mrb[34].mxu1 }
 0x253   :  { %v1646_v24 = vadd.f32 %v1644_v44, %v1636_v4  ;;  %v1648_v59 = vadd.f32 %v1644_v44, %v1638_v51  ;;  %v1593_v11 = vpop.f32.mrb[35].mxu0  ;;  %v1634_v20 = vpop.f32.mrb[35].mxu1 }
 0x254   :  { %v1647_v45 = vadd.f32 %v1644_v44, %v1637_v35  ;;  %v1649_v43 = vadd.f32 %v1644_v44, %v1639_v55 }
 0x255   :  { %v1654_v60 = vmul.f32 1.442695, %v1646_v24  ;;  %v1658_v58 = vmul.f32 1.442695, %v1648_v59  ;;  %vm1650_vm12 = vcmp.gt.f32.partialorder %v1646_v24, 0.0  ;;  %vm1652_vm11 = vcmp.gt.f32.partialorder %v1648_v59, 0.0 }
 0x256   :  { %v1656_v62 = vmul.f32 1.442695, %v1647_v45  ;;  %v1660_v63 = vmul.f32 1.442695, %v1649_v43  ;;  %vm1651_vm13 = vcmp.gt.f32.partialorder %v1647_v45, 0.0  ;;  %vm1653_vm10 = vcmp.gt.f32.partialorder %v1649_v43, 0.0 }
 0x257   :  { %3712 = vpow2.f32 %v1654_v60 }
 0x258   :  { %3714 = vpow2.f32 %v1656_v62 }
 0x259   :  { %3716 = vpow2.f32 %v1658_v58 }
 0x25a   :  { %3718 = vpow2.f32 %v1660_v63 }
 0x261   :  { %v3713_v13 = vpop.eup %3712 }
 0x262   :  { %v3715_v36 = vpop.eup %3714  ;;  %v3515_v40 = vadd.f32 -1.0, %v3713_v13 }
 0x263   :  { %v3717_v7 = vpop.eup %3716  ;;  %v3516_v5 = vadd.f32 -1.0, %v3715_v36 }
 0x264   :  { %v3719_v8 = vpop.eup %3718  ;;  %v1666_v9 = vsel %vm1650_vm12, %v1646_v24, %v3515_v40  ;;  %v3517_v14 = vadd.f32 -1.0, %v3717_v7 }
 0x265   :  { %v1667_v28 = vsel %vm1651_vm13, %v1647_v45, %v3516_v5  ;;  %v3518_v10 = vadd.f32 -1.0, %v3719_v8 }
 0x266   :  { %v1674_v16 = vcombine.low %v1666_v9, %v1667_v28  ;;  %v1668_v29 = vsel %vm1652_vm11, %v1648_v59, %v3517_v14 }
 0x267   :  { %v1669_v23 = vsel %vm1653_vm10, %v1649_v43, %v3518_v10 }
 0x268   :  { %1676 = vrot.lane.b32.xlu1 %v1674_v16, %s3805_s14  ;;  %v1675_v32 = vcombine.low %v1668_v29, %v1669_v23 }
 0x26c   :  { %1678 = vrot.lane.b32.xlu1 %v1675_v32, %s3805_s14 }
 0x270   :  { %1729 = vrot.lane.b32.xlu1 %v1728_v38, %s3814_s25 }
 0x274   :  { %1970 = vrot.lane.b32.xlu1 %v4336_v48, %s3815_s28 }
 0x278   :  { %2118 = vrot.lane.b32.xlu1 %v4336_v48, %s3816_s29 }
 0x2da   :  { %v1677_v44 = vpop.permute.xlu1 %1676 }
 0x2db   :  { %v1680_v17 = vrot.slane %v1677_v44, 4 }
 0x2dd   :  { %v1682_v47 = vsel %vm85_vm4, %v1680_v17, %v1677_v44 }
 0x2de   :  { %1688 = vst.msk [vmem:[#allocation2] sm:$0xff] %vm3990_vm5, %v1682_v47  ;;  %v1679_v3 = vpop.permute.xlu1 %1678 }
 0x2df   :  { %v1681_v4 = vrot.slane %v1679_v3, 4 }
 0x2e1   :  { %v1683_v51 = vsel %vm87_vm9, %v1680_v17, %v1681_v4  ;;  %1690 = vst.msk [vmem:[#allocation2 + $0x10] sm:$0xf] %vm60_vm0, %v1681_v4  ;;  %vm4627_vm0 = vcmask 777216  }
 0x2e2   :  { %v4348_v52 = vsel %vm85_vm4, %v1683_v51, %v1679_v3  ;;  %vm4628_vm4 = vmmov %vm4627_vm0 }
 0x2e3   :  { %v1948_v28 = vmul.f32 %v4348_v52, %v4053_v0  ;;  %v2096_v32 = vmul.f32 %v4348_v52, %v4072_v15  ;;  %vm4629_vm5 = vmmov %vm4627_vm0 }
 0x2e4   :  { %vm4630_vm9 = vmmov %vm4627_vm0 }
 0x2e5   :  { %v4350_v26 = vld [vmem:[#allocation2] sm:$0xff]  ;;  %v1954_v16 = vcombine.high %v1948_v28, %v1948_v28  ;;  %v1959_v29 = vpack.c.bf16 %v1948_v28, %v1948_v28  ;;  %v2107_v38 = vpack.c.bf16 %v2096_v32, %v2096_v32  ;;  %v2102_v17 = vcombine.high %v2096_v32, %v2096_v32 }
 0x2e6   :  { %v2250_v35 = vpack.c.bf16 %v4350_v26, %v4350_v26  ;;  %v1707_v55 = vmul.f32 %v4350_v26, %v4003_v21  ;;  %v1947_v6 = vmul.f32 %v4350_v26, %v4006_v22  ;;  %v2095_v24 = vmul.f32 %v4350_v26, %v4019_v34  ;;  %v2977_v28 = vld [vmem:[%s4619_s6] sm:$0xf] }
 0x2e7   :  { %v1708_v22 = vmul.f32 %v4348_v52, %v4027_v41  ;;  %v2246_v40 = vcombine.high %v4350_v26, %v4350_v26  ;;  %v1960_v23 = vpack.c.bf16 %v1954_v16, %v1954_v16  ;;  %v2108_v47 = vpack.c.bf16 %v2102_v17, %v2102_v17 }
 0x2e8   :  { %2270 = vrot.lane.b32.xlu0 %v2250_v35, %s3817_s3  ;;  %v1712_v56 = vcombine.high %v1707_v55, %v1707_v55  ;;  %v1706_v57 = vld [vmem:[#allocation2 + $0x10] sm:$0xf]  ;;  %v1716_v59 = vpack.c.bf16 %v1707_v55, %v1707_v55  ;;  %v1953_v20 = vcombine.high %v1947_v6, %v1947_v6  ;;  %v2101_v60 = vcombine.high %v2095_v24, %v2095_v24 }
 0x2e9   :  { %v1709_v45 = vmul.f32 %v1706_v57, %v3998_v19  ;;  %v1946_v58 = vld [vmem:[#allocation2 + $0x10] sm:$0xf]  ;;  %v1957_v62 = vpack.c.bf16 %v1947_v6, %v1947_v6  ;;  %v1713_v19 = vcombine.high %v1708_v22, %v1708_v22  ;;  %v2105_v7 = vpack.c.bf16 %v2095_v24, %v2095_v24 }
 0x2ea   :  { %v1717_v11 = vpack.c.bf16 %v1712_v56, %v1712_v56  ;;  %v1958_v21 = vpack.c.bf16 %v1953_v20, %v1953_v20  ;;  %v2106_v34 = vpack.c.bf16 %v2101_v60, %v2101_v60  ;;  %v1949_v63 = vmul.f32 %v1946_v58, %v4012_v27  ;;  %v2094_v41 = vld [vmem:[#allocation2 + $0x10] sm:$0xf] }
 0x2eb   :  { %v1720_v43 = vpack.c.bf16 %v1709_v45, %v1709_v45  ;;  %v1719_v36 = vpack.c.bf16 %v1713_v19, %v1713_v19  ;;  %v2251_v5 = vpack.c.bf16 %v2246_v40, %v2246_v40  ;;  %v2097_v8 = vmul.f32 %v2094_v41, %v4029_v42  ;;  %v2242_v15 = vld [vmem:[#allocation2 + $0x10] sm:$0xf] }
 0x2ec   :  { %1736 = vrot.lane.b32.xlu0 %v1716_v59, %s3818_s30  ;;  %1738 = vrot.lane.b32.xlu1 %v1717_v11, %s3818_s30  ;;  %v1961_v13 = vpack.c.bf16 %v1949_v63, %v1949_v63  ;;  %v2247_v27 = vcombine.high %v4348_v52, %v4348_v52  ;;  %v1718_v10 = vpack.c.bf16 %v1708_v22, %v1708_v22  ;;  %v2387_v56 = vld [vmem:[#allocation2 + $0x10] sm:$0xf] }
 0x2ed   :  { %v2109_v9 = vpack.c.bf16 %v2097_v8, %v2097_v8  ;;  %v2388_v42 = vmul.f32 %v4350_v26, %v4060_v2  ;;  %v2252_v2 = vpack.c.bf16 %v4348_v52, %v4348_v52  ;;  %v2536_v3 = vmul.f32 %v4350_v26, %v4083_v31  ;;  %v2535_v60 = vld [vmem:[#allocation2 + $0x10] sm:$0xf] }
 0x2ee   :  { %v2253_v14 = vpack.c.bf16 %v2247_v27, %v2247_v27  ;;  %v2254_v4 = vpack.c.bf16 %v2242_v15, %v2242_v15  ;;  %v2389_v6 = vmul.f32 %v4348_v52, %v4098_v46  ;;  %v2390_v57 = vmul.f32 %v2387_v56, %v4085_v33  ;;  %v2831_v27 = vld [vmem:[#allocation2 + $0x10] sm:$0xf] }
 0x2ef   :  { %v2394_v0 = vcombine.high %v2388_v42, %v2388_v42  ;;  %v2542_v51 = vcombine.high %v2536_v3, %v2536_v3  ;;  %v2398_v35 = vpack.c.bf16 %v2388_v42, %v2388_v42  ;;  %v2684_v59 = vmul.f32 %v4350_v26, %v4108_v54 }
 0x2f0   :  { %1979 = vrot.lane.b32.xlu1 %v1958_v21, %s3819_s1  ;;  %1744 = vrot.lane.b32.xlu0 %v1720_v43, %s3818_s30  ;;  %v2400_v31 = vpack.c.bf16 %v2389_v6, %v2389_v6  ;;  %v2395_v24 = vcombine.high %v2389_v6, %v2389_v6  ;;  %v2402_v11 = vpack.c.bf16 %v2390_v57, %v2390_v57 }
 0x2f1   :  { %v2399_v44 = vpack.c.bf16 %v2394_v0, %v2394_v0  ;;  %v2547_v55 = vpack.c.bf16 %v2542_v51, %v2542_v51  ;;  %v2690_v46 = vcombine.high %v2684_v59, %v2684_v59  ;;  %v2537_v45 = vmul.f32 %v4348_v52, %v4117_v61 }
 0x2f2   :  { %v2401_v20 = vpack.c.bf16 %v2395_v24, %v2395_v24  ;;  %v2546_v33 = vpack.c.bf16 %v2536_v3, %v2536_v3  ;;  %v2538_v58 = vmul.f32 %v2535_v60, %v4100_v49  ;;  %v2832_v63 = vmul.f32 %v4350_v26, %v4141_v30 }
 0x2f3   :  { %v2695_v21 = vpack.c.bf16 %v2690_v46, %v2690_v46  ;;  %v2543_v43 = vcombine.high %v2537_v45, %v2537_v45  ;;  %v2548_v54 = vpack.c.bf16 %v2537_v45, %v2537_v45  ;;  %v2694_v19 = vpack.c.bf16 %v2684_v59, %v2684_v59 }
 0x2f4   :  { %2127 = vrot.lane.b32.xlu1 %v2106_v34, %s3820_s10  ;;  %1977 = vrot.lane.b32.xlu0 %v1957_v62, %s3819_s1  ;;  %v2685_v34 = vmul.f32 %v4348_v52, %v4132_v18  ;;  %v2550_v61 = vpack.c.bf16 %v2538_v58, %v2538_v58  ;;  %v2838_v49 = vcombine.high %v2832_v63, %v2832_v63 }
 0x2f5   :  { %v2549_v22 = vpack.c.bf16 %v2543_v43, %v2543_v43  ;;  %v2833_v18 = vmul.f32 %v4348_v52, %v4151_v39  ;;  %v2842_v39 = vpack.c.bf16 %v2832_v63, %v2832_v63  ;;  %v1693_v15 = vmul.f32 %v4350_v26, %v3959_v50 }
 0x2f6   :  { %v2691_v62 = vcombine.high %v2685_v34, %v2685_v34  ;;  %v2696_v40 = vpack.c.bf16 %v2685_v34, %v2685_v34  ;;  %v2843_v41 = vpack.c.bf16 %v2838_v49, %v2838_v49 }
 0x2f8   :  { %1985 = vrot.lane.b32.xlu0 %v1961_v13, %s3819_s1  ;;  %1742 = vrot.lane.b32.xlu1 %v1719_v36, %s3818_s30  ;;  %v2697_v13 = vpack.c.bf16 %v2691_v62, %v2691_v62  ;;  %v2683_v36 = vld [vmem:[#allocation2 + $0x10] sm:$0xf] }
 0x2f9   :  { %v2686_v30 = vmul.f32 %v2683_v36, %v4120_v1  ;;  %v2834_v1 = vmul.f32 %v2831_v27, %v4134_v25 }
 0x2fc   :  { %2125 = vrot.lane.b32.xlu0 %v2105_v7, %s3820_s10  ;;  %2272 = vrot.lane.b32.xlu1 %v2251_v5, %s3817_s3  ;;  %v2839_v7 = vcombine.high %v2833_v18, %v2833_v18  ;;  %v2698_v5 = vpack.c.bf16 %v2686_v30, %v2686_v30 }
 0x2fe   :  { %v2845_v8 = vpack.c.bf16 %v2839_v7, %v2839_v7 }
 0x300   :  { %2133 = vrot.lane.b32.xlu0 %v2109_v9, %s3820_s10  ;;  %2276 = vrot.lane.b32.xlu1 %v2253_v14, %s3817_s3  ;;  %v2844_v9 = vpack.c.bf16 %v2833_v18, %v2833_v18  ;;  %v2846_v14 = vpack.c.bf16 %v2834_v1, %v2834_v1 }
 0x304   :  { %1740 = vrot.lane.b32.xlu0 %v1718_v10, %s3818_s30  ;;  %2263 = vrot.lane.b32.xlu1 %v4336_v48, %s3820_s10  ;;  %v1730_v10 = vpop.permute.xlu1 %1729 }
 0x308   :  { %1981 = vrot.lane.b32.xlu0 %v1959_v29, %s3819_s1  ;;  %1983 = vrot.lane.b32.xlu1 %v1960_v23, %s3819_s1  ;;  %v4448_v16 = vpop.permute.xlu1 %1970 }
 0x30c   :  { %2129 = vrot.lane.b32.xlu0 %v2107_v38, %s3820_s10  ;;  %2420 = vrot.lane.b32.xlu1 %v2399_v44, %s3822_s11  ;;  %v4450_v42 = vpop.permute.xlu1 %2118 }
 0x310   :  { %2274 = vrot.lane.b32.xlu0 %v2252_v2, %s3817_s3  ;;  %2131 = vrot.lane.b32.xlu1 %v2108_v47, %s3820_s10 }
 0x314   :  { %2278 = vrot.lane.b32.xlu0 %v2254_v4, %s3817_s3  ;;  %2411 = vrot.lane.b32.xlu1 %v4336_v48, %s3823_s13  ;;  %v1694_v4 = vmul.f32 %v4348_v52, %v3962_v53 }
 0x316   :  { %v1699_v6 = vcombine.high %v1694_v4, %v1694_v4  ;;  %v1704_v26 = vpack.c.bf16 %v1694_v4, %v1694_v4 }
 0x318   :  { %2418 = vrot.lane.b32.xlu0 %v2398_v35, %s3822_s11  ;;  %2568 = vrot.lane.b32.xlu1 %v2547_v55, %s3824_s2  ;;  %v1698_v55 = vcombine.high %v1693_v15, %v1693_v15  ;;  %v1705_v52 = vpack.c.bf16 %v1699_v6, %v1699_v6 }
 0x31c   :  { %2422 = vrot.lane.b32.xlu0 %v2400_v31, %s3822_s11  ;;  %2559 = vrot.lane.b32.xlu1 %v4336_v48, %s3825_s12 }
 0x320   :  { %2426 = vrot.lane.b32.xlu0 %v2402_v11, %s3822_s11  ;;  %2424 = vrot.lane.b32.xlu1 %v2401_v20, %s3822_s11  ;;  %v1703_v11 = vpack.c.bf16 %v1698_v55, %v1698_v55  ;;  %v1702_v20 = vpack.c.bf16 %v1693_v15, %v1693_v15 }
 0x324   :  { %2566 = vrot.lane.b32.xlu0 %v2546_v33, %s3824_s2  ;;  %2716 = vrot.lane.b32.xlu1 %v2695_v21, %s3826_s15  ;;  %v1851_v33 = vsel %vm216_vm15, %v1702_v20, 0  ;;  %v1857_v21 = vsel %vm216_vm15, %v1704_v26, 0 }
 0x328   :  { %2570 = vrot.lane.b32.xlu0 %v2548_v54, %s3824_s2  ;;  %2572 = vrot.lane.b32.xlu1 %v2549_v22, %s3824_s2 }
 0x32c   :  { %2574 = vrot.lane.b32.xlu0 %v2550_v61, %s3824_s2  ;;  %2707 = vrot.lane.b32.xlu1 %v4336_v48, %s3827_s16 }
 0x330   :  { %2714 = vrot.lane.b32.xlu0 %v2694_v19, %s3826_s15  ;;  %2720 = vrot.lane.b32.xlu1 %v2697_v13, %s3826_s15 }
 0x334   :  { %2718 = vrot.lane.b32.xlu0 %v2696_v40, %s3826_s15  ;;  %2864 = vrot.lane.b32.xlu1 %v2843_v41, %s3828_s17 }
 0x338   :  { %2722 = vrot.lane.b32.xlu0 %v2698_v5, %s3826_s15  ;;  %2868 = vrot.lane.b32.xlu1 %v2845_v8, %s3828_s17 }
 0x33c   :  { %2862 = vrot.lane.b32.xlu0 %v2842_v39, %s3828_s17  ;;  %2855 = vrot.lane.b32.xlu1 %v4336_v48, %s3824_s2 }
 0x340   :  { %2866 = vrot.lane.b32.xlu0 %v2844_v9, %s3828_s17 }
 0x344   :  { %2870 = vrot.lane.b32.xlu0 %v2846_v14, %s3828_s17 }
 0x348   :  { %2980 = vperm.xlu0 %3676, %v2977_v28  }
 0x35a   :  { %v4452_v29 = vpop.permute.xlu0 %2270 }
 0x35e   :  { %v1737_v48 = vpop.permute.xlu0 %1736  ;;  %v1739_v23 = vpop.permute.xlu1 %1738 }
 0x35f   :  { %v1746_v56 = vsel %vm207_vm14, %v1737_v48, %v1739_v23 }
 0x360   :  { %v1754_v50 = vsel %vm216_vm15, %v1746_v56, 0 }
 0x362   :  { %v1745_v25 = vpop.permute.xlu0 %1744  ;;  %v1980_v32 = vpop.permute.xlu1 %1979 }
 0x366   :  { %v1978_v0 = vpop.permute.xlu0 %1977  ;;  %v4454_v38 = vpop.permute.xlu1 %2127 }
 0x367   :  { %v1987_v58 = vsel %vm483_vm2, %v1978_v0, %v1980_v32 }
 0x368   :  { %v1995_v19 = vsel %vm216_vm15, %v1987_v58, 0 }
 0x36a   :  { %v1986_v44 = vpop.permute.xlu0 %1985  ;;  %v1743_v17 = vpop.permute.xlu1 %1742 }
 0x36b   :  { %v1749_v2 = vsel %vm207_vm14, %v1743_v17, %v1745_v25 }
 0x36c   :  { %3521 = vmatprep.subr.msk.bf16.mxu1 %vm216_vm15, %v1749_v2 }
 0x36e   :  { %v2126_v47 = vpop.permute.xlu0 %2125  ;;  %v4458_v3 = vpop.permute.xlu1 %2272 }
 0x36f   :  { %v2135_v40 = vsel %vm664_vm3, %v2126_v47, %v4454_v38  ;;  %v2280_v1 = vsel %vm810_vm6, %v4452_v29, %v4458_v3 }
 0x370   :  { %v2143_v7 = vsel %vm216_vm15, %v2135_v40, 0  ;;  %v2288_v48 = vsel %vm216_vm15, %v2280_v1, 0 }
 0x372   :  { %v2134_v51 = vpop.permute.xlu0 %2133  ;;  %v4464_v35 = vpop.permute.xlu1 %2276 }
 0x376   :  { %v1741_v31 = vpop.permute.xlu0 %1740  ;;  %v4467_v57 = vpop.permute.xlu1 %2263 }
 0x377   :  { %v1747_v24 = vsel %vm207_vm14, %v1739_v23, %v1741_v31  ;;  %v1748_v59 = vsel %vm207_vm14, %v1741_v31, %v1743_v17  ;;  %vm4631_vm14 = vcmask 769024  }
 0x378   :  { %v1760_v53 = vsel %vm216_vm15, %v1748_v59, 0  ;;  %3519 = vmatprep.subr.msk.bf16.mxu0 %vm216_vm15, %v1747_v24 }
 0x379   :  { %1766 = vmatpush1.bf16.msra.mxu0 %v1754_v50  ;;  %1807 = vmatpush1.bf16.msra.mxu1 %v1760_v53 }
 0x37a   :  { %v1982_v46 = vpop.permute.xlu0 %1981  ;;  %3523 = vmatprep.subr.msk.bf16.mxu0 %vm216_vm15, %v1703_v11  ;;  %3525 = vmatprep.subr.msk.bf16.mxu1 %vm216_vm15, %v1705_v52  ;;  %v1984_v45 = vpop.permute.xlu1 %1983 }
 0x37b   :  { %v1988_v43 = vsel %vm483_vm2, %v1980_v32, %v1982_v46  ;;  %v1990_v60 = vsel %vm483_vm2, %v1984_v45, %v1986_v44  ;;  %v1989_v34 = vsel %vm483_vm2, %v1982_v46, %v1984_v45  ;;  %vm4632_vm2 = vmmov %vm4631_vm14 }
 0x37c   :  { %3520 = vmatmul.mubr.msk.bf16.vlgmr.msra.gmra.mrb[36].mxu0 %vm212_vm1, %v1730_v10  ;;  %3522 = vmatmul.mubr.msk.bf16.vlgmr.msra.gmra.mrb[36].mxu1 %vm212_vm1, %v1730_v10  ;;  %v2001_v13 = vsel %vm216_vm15, %v1989_v34, 0 }
 0x37d   :  { %1863 = vmatpush1.bf16.msra.mxu0 %v1851_v33  ;;  %1904 = vmatpush1.bf16.msra.mxu1 %v1857_v21 }
 0x37e   :  { %v2130_v54 = vpop.permute.xlu0 %2129  ;;  %3528 = vmatprep.subr.msk.bf16.mxu0 %vm216_vm15, %v1988_v43  ;;  %3530 = vmatprep.subr.msk.bf16.mxu1 %vm216_vm15, %v1990_v60  ;;  %v2421_v22 = vpop.permute.xlu1 %2420 }
 0x37f   :  { %1894 = vmatprep.mubr.bf16.mxu0 %v3821_v12  ;;  %1935 = vmatprep.mubr.bf16.mxu1 %v3821_v12  ;;  %v2136_v49 = vsel %vm664_vm3, %v4454_v38, %v2130_v54 }
 0x382   :  { %v2275_v61 = vpop.permute.xlu0 %2274  ;;  %v2132_v62 = vpop.permute.xlu1 %2131 }
 0x383   :  { %v2138_v63 = vsel %vm664_vm3, %v2132_v62, %v2134_v51  ;;  %v2281_v8 = vsel %vm810_vm6, %v4458_v3, %v2275_v61  ;;  %v2282_v14 = vsel %vm810_vm6, %v2275_v61, %v4464_v35 }
 0x384   :  { %3524 = vmatmul.mubr.msk.bf16.vlgmr.msra.gmra.mrb[40].mxu0 %vm212_vm1, %v4327_v37  ;;  %3526 = vmatmul.mubr.msk.bf16.vlgmr.msra.gmra.mrb[40].mxu1 %vm212_vm1, %v4327_v37  ;;  %v2137_v37 = vsel %vm664_vm3, %v2130_v54, %v2132_v62  ;;  %v2294_v23 = vsel %vm216_vm15, %v2282_v14, 0  ;;  %vm4633_vm3 = vmmov %vm4632_vm2  ;;  %v3012_v62 = vld [vmem:[%s4621_s8] sm:$0xff] }
 0x385   :  { %2007 = vmatpush1.bf16.msra.mxu0 %v1995_v19  ;;  %2048 = vmatpush1.bf16.msra.mxu1 %v2001_v13  ;;  %v2149_v5 = vsel %vm216_vm15, %v2137_v37, 0 }
 0x386   :  { %3533 = vmatprep.subr.msk.bf16.mxu0 %vm216_vm15, %v2136_v49  ;;  %3535 = vmatprep.subr.msk.bf16.mxu1 %vm216_vm15, %v2138_v63  ;;  %v2279_v18 = vpop.permute.xlu0 %2278  ;;  %v4499_v36 = vpop.permute.xlu1 %2411 }
 0x387   :  { %2038 = vmatprep.mubr.bf16.mxu0 %v3821_v12  ;;  %2079 = vmatprep.mubr.bf16.mxu1 %v3821_v12  ;;  %v2283_v39 = vsel %vm810_vm6, %v4464_v35, %v2279_v18  ;;  %vm4634_vm6 = vmmov %vm4632_vm2 }
 0x388   :  { %3015 = vperm.xlu1 %3677, %v3012_v62  }
 0x38a   :  { %v2419_v41 = vpop.permute.xlu0 %2418  ;;  %v2569_v30 = vpop.permute.xlu1 %2568 }
 0x38b   :  { %v2428_v0 = vsel %vm991_vm7, %v2419_v41, %v2421_v22 }
 0x38c   :  { %3529 = vmatmul.mubr.msk.bf16.vlgmr.msra.gmra.mrb[44].mxu0 %vm212_vm1, %v4448_v16  ;;  %3531 = vmatmul.mubr.msk.bf16.vlgmr.msra.gmra.mrb[44].mxu1 %vm212_vm1, %v4448_v16  ;;  %v2436_v17 = vsel %vm216_vm15, %v2428_v0, 0 }
 0x38d   :  { %2155 = vmatpush1.bf16.msra.mxu0 %v2143_v7  ;;  %2196 = vmatpush1.bf16.msra.mxu1 %v2149_v5 }
 0x38e   :  { %3538 = vmatprep.subr.msk.bf16.mxu0 %vm216_vm15, %v2281_v8  ;;  %3540 = vmatprep.subr.msk.bf16.mxu1 %vm216_vm15, %v2283_v39  ;;  %v2423_v27 = vpop.permute.xlu0 %2422  ;;  %v2560_v9 = vpop.permute.xlu1 %2559 }
 0x38f   :  { %2186 = vmatprep.mubr.bf16.mxu0 %v3821_v12  ;;  %2227 = vmatprep.mubr.bf16.mxu1 %v3821_v12  ;;  %v2429_v25 = vsel %vm991_vm7, %v2421_v22, %v2423_v27 }
 0x392   :  { %v2427_v28 = vpop.permute.xlu0 %2426  ;;  %v2425_v10 = vpop.permute.xlu1 %2424 }
 0x393   :  { %v2431_v16 = vsel %vm991_vm7, %v2425_v10, %v2427_v28  ;;  %v2430_v38 = vsel %vm991_vm7, %v2423_v27, %v2425_v10 }
 0x394   :  { %3534 = vmatmul.mubr.msk.bf16.vlgmr.msra.gmra.mrb[48].mxu0 %vm212_vm1, %v4450_v42  ;;  %3536 = vmatmul.mubr.msk.bf16.vlgmr.msra.gmra.mrb[48].mxu1 %vm212_vm1, %v4450_v42  ;;  %v2442_v2 = vsel %vm216_vm15, %v2430_v38, 0 }
 0x395   :  { %2300 = vmatpush1.bf16.msra.mxu0 %v2288_v48  ;;  %2341 = vmatpush1.bf16.msra.mxu1 %v2294_v23 }
 0x396   :  { %3543 = vmatprep.subr.msk.bf16.mxu0 %vm216_vm15, %v2429_v25  ;;  %3545 = vmatprep.subr.msk.bf16.mxu1 %vm216_vm15, %v2431_v16  ;;  %v2567_v29 = vpop.permute.xlu0 %2566  ;;  %v2717_v32 = vpop.permute.xlu1 %2716 }
 0x397   :  { %2331 = vmatprep.mubr.bf16.mxu0 %v3821_v12  ;;  %2372 = vmatprep.mubr.bf16.mxu1 %v3821_v12  ;;  %v2576_v4 = vsel %vm1172_vm8, %v2567_v29, %v2569_v30 }
 0x398   :  { %v2584_v6 = vsel %vm216_vm15, %v2576_v4, 0 }
 0x39a   :  { %v2571_v44 = vpop.permute.xlu0 %2570  ;;  %v2573_v47 = vpop.permute.xlu1 %2572 }
 0x39b   :  { %v2577_v42 = vsel %vm1172_vm8, %v2569_v30, %v2571_v44  ;;  %v2578_v51 = vsel %vm1172_vm8, %v2571_v44, %v2573_v47 }
 0x39c   :  { %3539 = vmatmul.mubr.msk.bf16.vlgmr.msra.gmra.mrb[52].mxu0 %vm212_vm1, %v4467_v57  ;;  %3541 = vmatmul.mubr.msk.bf16.vlgmr.msra.gmra.mrb[52].mxu1 %vm212_vm1, %v4467_v57  ;;  %v2590_v56 = vsel %vm216_vm15, %v2578_v51, 0 }
 0x39d   :  { %2448 = vmatpush1.bf16.msra.mxu0 %v2436_v17  ;;  %2489 = vmatpush1.bf16.msra.mxu1 %v2442_v2 }
 0x39e   :  { %3548 = vmatprep.subr.msk.bf16.mxu0 %vm216_vm15, %v2577_v42  ;;  %v2575_v3 = vpop.permute.xlu0 %2574  ;;  %2479 = vmatprep.mubr.bf16.mxu0 %v3821_v12  ;;  %v2708_v35 = vpop.permute.xlu1 %2707 }
 0x39f   :  { %v2579_v15 = vsel %vm1172_vm8, %v2573_v47, %v2575_v3  ;;  %2520 = vmatprep.mubr.bf16.mxu1 %v3821_v12 }
 0x3a0   :  { %3550 = vmatprep.subr.msk.bf16.mxu1 %vm216_vm15, %v2579_v15 }
 0x3a2   :  { %v2715_v55 = vpop.permute.xlu0 %2714  ;;  %v2721_v24 = vpop.permute.xlu1 %2720 }
 0x3a3   :  { %v2724_v59 = vsel %vm4628_vm4, %v2715_v55, %v2717_v32 }
 0x3a4   :  { %3544 = vmatmul.mubr.msk.bf16.vlgmr.msra.gmra.mrb[56].mxu0 %vm212_vm1, %v4499_v36  ;;  %3546 = vmatmul.mubr.msk.bf16.vlgmr.msra.gmra.mrb[56].mxu1 %vm212_vm1, %v4499_v36  ;;  %v2732_v53 = vsel %vm216_vm15, %v2724_v59, 0 }
 0x3a5   :  { %2596 = vmatpush1.bf16.msra.mxu0 %v2584_v6  ;;  %2637 = vmatpush1.bf16.msra.mxu1 %v2590_v56 }
 0x3a6   :  { %v2719_v31 = vpop.permute.xlu0 %2718  ;;  %2627 = vmatprep.mubr.bf16.mxu0 %v3821_v12  ;;  %2668 = vmatprep.mubr.bf16.mxu1 %v3821_v12  ;;  %v2865_v26 = vpop.permute.xlu1 %2864 }
 0x3a7   :  { %v2725_v57 = vsel %vm4627_vm0, %v2717_v32, %v2719_v31  ;;  %v2726_v11 = vsel %vm4629_vm5, %v2719_v31, %v2721_v24 }
 0x3a8   :  { %3553 = vmatprep.subr.msk.bf16.mxu0 %vm216_vm15, %v2725_v57  ;;  %v2738_v52 = vsel %vm216_vm15, %v2726_v11, 0 }
 0x3aa   :  { %v2723_v20 = vpop.permute.xlu0 %2722  ;;  %v2869_v43 = vpop.permute.xlu1 %2868 }
 0x3ab   :  { %v2727_v50 = vsel %vm4630_vm9, %v2721_v24, %v2723_v20 }
 0x3ac   :  { %3549 = vmatmul.mubr.msk.bf16.vlgmr.msra.gmra.mrb[60].mxu0 %vm212_vm1, %v2560_v9  ;;  %3551 = vmatmul.mubr.msk.bf16.vlgmr.msra.gmra.mrb[60].mxu1 %vm212_vm1, %v2560_v9 }
 0x3ad   :  { %2744 = vmatpush1.bf16.msra.mxu0 %v2732_v53  ;;  %3555 = vmatprep.subr.msk.bf16.mxu1 %vm216_vm15, %v2727_v50 }
 0x3ae   :  { %2785 = vmatpush1.bf16.msra.mxu1 %v2738_v52  ;;  %v2863_v46 = vpop.permute.xlu0 %2862  ;;  %2775 = vmatprep.mubr.bf16.mxu0 %v3821_v12  ;;  %v2856_v61 = vpop.permute.xlu1 %2855 }
 0x3af   :  { %2816 = vmatprep.mubr.bf16.mxu1 %v3821_v12  ;;  %v2872_v45 = vsel %vm4631_vm14, %v2863_v46, %v2865_v26 }
 0x3b0   :  { %v2880_v60 = vsel %vm216_vm15, %v2872_v45, 0 }
 0x3b2   :  { %v2867_v33 = vpop.permute.xlu0 %2866 }
 0x3b3   :  { %v2873_v21 = vsel %vm4632_vm2, %v2865_v26, %v2867_v33  ;;  %v2874_v54 = vsel %vm4633_vm3, %v2867_v33, %v2869_v43 }
 0x3b4   :  { %3554 = vmatmul.mubr.msk.bf16.vlgmr.msra.gmra.mrb[64].mxu0 %vm212_vm1, %v2708_v35  ;;  %3556 = vmatmul.mubr.msk.bf16.vlgmr.msra.gmra.mrb[64].mxu1 %vm212_vm1, %v2708_v35  ;;  %v2886_v34 = vsel %vm216_vm15, %v2874_v54, 0 }
 0x3b5   :  { %3558 = vmatprep.subr.msk.bf16.mxu0 %vm216_vm15, %v2873_v21  ;;  %2923 = vmatprep.mubr.bf16.mxu0 %v3821_v12 }
 0x3b6   :  { %2892 = vmatpush1.bf16.msra.mxu0 %v2880_v60  ;;  %v2871_v22 = vpop.permute.xlu0 %2870  ;;  %2964 = vmatprep.mubr.bf16.mxu1 %v3821_v12 }
 0x3b7   :  { %v2875_v58 = vsel %vm4634_vm6, %v2869_v43, %v2871_v22 }
 0x3b8   :  { %3560 = vmatprep.subr.msk.bf16.mxu1 %vm216_vm15, %v2875_v58 }
 0x3b9   :  { %2933 = vmatpush1.bf16.msra.mxu1 %v2886_v34 }
 0x3bc   :  { %3559 = vmatmul.mubr.msk.bf16.vlgmr.msra.gmra.mrb[68].mxu0 %vm212_vm1, %v2856_v61  ;;  %3561 = vmatmul.mubr.msk.bf16.vlgmr.msra.gmra.mrb[68].mxu1 %vm212_vm1, %v2856_v61 }
 0x3bd   :  { %3065 = vmatprep.mubr.bf16.mxu0 %v3821_v12  ;;  %3106 = vmatprep.mubr.bf16.mxu1 %v3821_v12 }
 0x44f   :  { %v1799_v63 = vpop.f32.mrb[36].mxu0  ;;  %v1840_v19 = vpop.f32.mrb[36].mxu1 }
 0x450   :  { %v1801_v13 = vpop.f32.mrb[37].mxu0  ;;  %v1842_v49 = vpop.f32.mrb[37].mxu1 }
 0x451   :  { %v1803_v18 = vpop.f32.mrb[38].mxu0  ;;  %v1844_v36 = vpop.f32.mrb[38].mxu1 }
 0x452   :  { %v1804_v40 = vpop.f32.mrb[39].mxu0  ;;  %v1845_v37 = vpop.f32.mrb[39].mxu1 }
 0x457   :  { %v1896_v41 = vpop.f32.mrb[40].mxu0  ;;  %v1937_v30 = vpop.f32.mrb[40].mxu1 }
 0x458   :  { %v1897_v7 = vadd.f32 %v1896_v41, %v1799_v63  ;;  %v1938_v5 = vadd.f32 %v1937_v30, %v1840_v19  ;;  %v1898_v8 = vpop.f32.mrb[41].mxu0  ;;  %v1939_v39 = vpop.f32.mrb[41].mxu1 }
 0x459   :  { %v1899_v12 = vadd.f32 %v1898_v8, %v1801_v13  ;;  %v1940_v27 = vadd.f32 %v1939_v39, %v1842_v49  ;;  %v1900_v9 = vpop.f32.mrb[42].mxu0  ;;  %v1941_v1 = vpop.f32.mrb[42].mxu1 }
 0x45a   :  { %v1901_v14 = vpop.f32.mrb[43].mxu0  ;;  %v1942_v28 = vpop.f32.mrb[43].mxu1 }
 0x45f   :  { %v2040_v10 = vpop.f32.mrb[44].mxu0  ;;  %v2081_v16 = vpop.f32.mrb[44].mxu1 }
 0x460   :  { %v2088_v48 = vadd.f32 %v2040_v10, %v1897_v7  ;;  %v2090_v23 = vadd.f32 %v2081_v16, %v1938_v5  ;;  %v2042_v25 = vpop.f32.mrb[45].mxu0  ;;  %v2083_v29 = vpop.f32.mrb[45].mxu1 }
 0x461   :  { %v2089_v32 = vadd.f32 %v2042_v25, %v1899_v12  ;;  %v2091_v0 = vadd.f32 %v2083_v29, %v1940_v27  ;;  %v2044_v38 = vpop.f32.mrb[46].mxu0  ;;  %v2085_v44 = vpop.f32.mrb[46].mxu1 }
 0x462   :  { %v2045_v42 = vpop.f32.mrb[47].mxu0  ;;  %v2086_v17 = vpop.f32.mrb[47].mxu1 }
 0x463   :  { %v2981_v38 = vpop.permute.xlu0 %2980 }
 0x467   :  { %v2188_v2 = vpop.f32.mrb[48].mxu0  ;;  %v2229_v47 = vpop.f32.mrb[48].mxu1 }
 0x468   :  { %v2236_v3 = vadd.f32 %v2188_v2, %v2088_v48  ;;  %v2238_v15 = vadd.f32 %v2229_v47, %v2090_v23  ;;  %v2190_v4 = vpop.f32.mrb[49].mxu0  ;;  %v2231_v51 = vpop.f32.mrb[49].mxu1 }
 0x469   :  { %v2237_v35 = vadd.f32 %v2190_v4, %v2089_v32  ;;  %v2239_v55 = vadd.f32 %v2231_v51, %v2091_v0  ;;  %v2192_v6 = vpop.f32.mrb[50].mxu0  ;;  %v2233_v56 = vpop.f32.mrb[50].mxu1 }
 0x46a   :  { %v2193_v31 = vpop.f32.mrb[51].mxu0  ;;  %v2234_v57 = vpop.f32.mrb[51].mxu1 }
 0x46f   :  { %v2333_v24 = vpop.f32.mrb[52].mxu0  ;;  %v2374_v59 = vpop.f32.mrb[52].mxu1 }
 0x470   :  { %v2381_v11 = vadd.f32 %v2333_v24, %v2236_v3  ;;  %v2383_v20 = vadd.f32 %v2374_v59, %v2238_v15  ;;  %v2335_v50 = vpop.f32.mrb[53].mxu0  ;;  %v2376_v53 = vpop.f32.mrb[53].mxu1 }
 0x471   :  { %v2382_v52 = vadd.f32 %v2335_v50, %v2237_v35  ;;  %v2384_v26 = vadd.f32 %v2376_v53, %v2239_v55  ;;  %v2337_v46 = vpop.f32.mrb[54].mxu0  ;;  %v2378_v45 = vpop.f32.mrb[54].mxu1 }
 0x472   :  { %v2338_v33 = vpop.f32.mrb[55].mxu0  ;;  %v2379_v21 = vpop.f32.mrb[55].mxu1 }
 0x477   :  { %v2481_v43 = vpop.f32.mrb[56].mxu0  ;;  %v2522_v60 = vpop.f32.mrb[56].mxu1 }
 0x478   :  { %v2529_v54 = vadd.f32 %v2481_v43, %v2381_v11  ;;  %v2531_v22 = vadd.f32 %v2522_v60, %v2383_v20  ;;  %v2483_v58 = vpop.f32.mrb[57].mxu0  ;;  %v2524_v34 = vpop.f32.mrb[57].mxu1 }
 0x479   :  { %v2530_v61 = vadd.f32 %v2483_v58, %v2382_v52  ;;  %v2532_v62 = vadd.f32 %v2524_v34, %v2384_v26  ;;  %v2485_v63 = vpop.f32.mrb[58].mxu0  ;;  %v2526_v19 = vpop.f32.mrb[58].mxu1 }
 0x47a   :  { %v2486_v13 = vpop.f32.mrb[59].mxu0  ;;  %v2527_v49 = vpop.f32.mrb[59].mxu1  ;;  %v3680_v19 = vld [vmem:[#allocation6 + $0x40] sm:$0xff]  }
 0x47f   :  { %v2629_v18 = vpop.f32.mrb[60].mxu0  ;;  %v2670_v36 = vpop.f32.mrb[60].mxu1 }
 0x480   :  { %v2677_v40 = vadd.f32 %v2629_v18, %v2529_v54  ;;  %v2679_v37 = vadd.f32 %v2670_v36, %v2531_v22  ;;  %v2631_v41 = vpop.f32.mrb[61].mxu0  ;;  %v2672_v30 = vpop.f32.mrb[61].mxu1  ;;  %v3681_v18 = vld [vmem:[#allocation6 + $0xc0] sm:$0xff]   ;;  %v3007_v36 = vld [vmem:[%s4620_s7] sm:$0xf]  ;;  %s3829_s7 = smov [#allocation8]  }
 0x481   :  { %v2678_v7 = vadd.f32 %v2631_v41, %v2530_v61  ;;  %v2680_v5 = vadd.f32 %v2672_v30, %v2532_v62  ;;  %v2633_v8 = vpop.f32.mrb[62].mxu0  ;;  %v2674_v39 = vpop.f32.mrb[62].mxu1  ;;  %v3684_v41 = vld [vmem:[#allocation6 + $0x48] sm:$0xff]   ;;  %s3462_s24 = sshll.u32 %s3829_s7, 4  ;;  %s3463_s24 = int_to_ptr.vmem [resolvable:$true] %s3462_s24 }
 0x482   :  { %v2634_v12 = vpop.f32.mrb[63].mxu0  ;;  %v2675_v27 = vpop.f32.mrb[63].mxu1  ;;  %v3685_v30 = vld [vmem:[#allocation6 + $0xc8] sm:$0xff]   ;;  %v3688_v8 = vld [vmem:[#allocation6 + $0x50] sm:$0xff]   ;;  %s3772_s25 = scalar_lea.vmem %s3463_s24, 128  ;;  %p3777_p3 = scmp.lt.s32.totalorder %s3463_s24, %s3463_s24 }
 0x483   :  { %v3689_v39 = vld [vmem:[#allocation6 + $0xd0] sm:$0xff]   ;;  %p3773_p2 = scmp.ne.s32.totalorder %s3463_s24, %s3772_s25  ;;  %p3778_p4 = scmp.lt.s32.totalorder %s3772_s25, %s3772_s25 }
 0x484   :  { %v3690_v12 = vld [vmem:[#allocation6 + $0x10] sm:$0xff]  }
 0x485   :  { %v3691_v27 = vld [vmem:[#allocation6 + $0x90] sm:$0xff]   ;;  %p3779_p5 = por %p3778_p4, %p3777_p3 }
 0x487   :  { %v2777_v9 = vpop.f32.mrb[64].mxu0  ;;  %v2818_v1 = vpop.f32.mrb[64].mxu1  ;;  %p3780_p6 = pnand %p3779_p5, %p3773_p2 }
 0x488   :  { %v2825_v14 = vadd.f32 %v2777_v9, %v2677_v40  ;;  %v2827_v28 = vadd.f32 %v2818_v1, %v2679_v37  ;;  %v2779_v10 = vpop.f32.mrb[65].mxu0  ;;  %v2820_v16 = vpop.f32.mrb[65].mxu1  ;;  %v3682_v40 = vld [vmem:[#allocation6] sm:$0xff]   ;;  %v3692_v9 = vld [vmem:[#allocation6 + $0x58] sm:$0xff]  }
 0x489   :  { %v2826_v48 = vadd.f32 %v2779_v10, %v2678_v7  ;;  %v2828_v23 = vadd.f32 %v2820_v16, %v2680_v5  ;;  %v2781_v25 = vpop.f32.mrb[66].mxu0  ;;  %v2822_v29 = vpop.f32.mrb[66].mxu1  ;;  %v3683_v37 = vld [vmem:[#allocation6 + $0x80] sm:$0xff]   ;;  %v3686_v7 = vld [vmem:[#allocation6 + $0x8] sm:$0xff]   ;;  %v3693_v1 = vld [vmem:[#allocation6 + $0xd8] sm:$0xff]  }
 0x48a   :  { %v2782_v32 = vpop.f32.mrb[67].mxu0  ;;  %v2823_v0 = vpop.f32.mrb[67].mxu1  ;;  %v3687_v5 = vld [vmem:[#allocation6 + $0x88] sm:$0xff]   ;;  %v3696_v10 = vld [vmem:[#allocation6 + $0x60] sm:$0xff]  }
 0x48b   :  { %v3697_v16 = vld [vmem:[#allocation6 + $0xe0] sm:$0xff]   ;;  %v3700_v25 = vld [vmem:[#allocation6 + $0x68] sm:$0xff]  }
 0x48c   :  { %v3701_v29 = vld [vmem:[#allocation6 + $0xe8] sm:$0xff]  }
 0x48d   :  { %v3702_v32 = vld [vmem:[#allocation6 + $0x28] sm:$0xff]  }
 0x48e   :  { %v3703_v0 = vld [vmem:[#allocation6 + $0xa8] sm:$0xff]  }
 0x48f   :  { %v2925_v44 = vpop.f32.mrb[68].mxu0  ;;  %v2966_v42 = vpop.f32.mrb[68].mxu1 }
 0x490   :  { %v2973_v17 = vadd.f32 %v2925_v44, %v2825_v14  ;;  %v2975_v2 = vadd.f32 %v2966_v42, %v2827_v28  ;;  %v2927_v47 = vpop.f32.mrb[69].mxu0  ;;  %v2968_v3 = vpop.f32.mrb[69].mxu1  ;;  %v3694_v14 = vld [vmem:[#allocation6 + $0x18] sm:$0xff]   ;;  %v3705_v44 = vld [vmem:[#allocation6 + $0xf0] sm:$0xff]  }
 0x491   :  { %v2974_v15 = vadd.f32 %v2927_v47, %v2826_v48  ;;  %v2976_v4 = vadd.f32 %v2968_v3, %v2828_v23  ;;  %v2929_v51 = vpop.f32.mrb[70].mxu0  ;;  %v2970_v35 = vpop.f32.mrb[70].mxu1  ;;  %v3695_v28 = vld [vmem:[#allocation6 + $0x98] sm:$0xff]   ;;  %v3698_v48 = vld [vmem:[#allocation6 + $0x20] sm:$0xff]   ;;  %v3706_v42 = vld [vmem:[#allocation6 + $0x30] sm:$0xff]  }
 0x492   :  { %v2983_v55 = vadd.f32 %v2981_v38, %v2973_v17  ;;  %v2985_v6 = vadd.f32 %v2981_v38, %v2975_v2  ;;  %v2930_v56 = vpop.f32.mrb[71].mxu0  ;;  %v2971_v31 = vpop.f32.mrb[71].mxu1  ;;  %v3699_v23 = vld [vmem:[#allocation6 + $0xa0] sm:$0xff]   ;;  %v3707_v17 = vld [vmem:[#allocation6 + $0xb0] sm:$0xff]   ;;  %v3708_v2 = vld [vmem:[#allocation6 + $0x78] sm:$0xff]  }
 0x493   :  { %v2984_v57 = vadd.f32 %v2981_v38, %v2974_v15  ;;  %v2986_v24 = vadd.f32 %v2981_v38, %v2976_v4  ;;  %v3704_v38 = vld [vmem:[#allocation6 + $0x70] sm:$0xff]   ;;  %v3709_v47 = vld [vmem:[#allocation6 + $0xf8] sm:$0xff]   ;;  %v3016_v4 = vpop.permute.xlu1 %3015 }
 0x494   :  { %v2991_v59 = vmul.f32 1.442695, %v2983_v55  ;;  %v2995_v11 = vmul.f32 1.442695, %v2985_v6  ;;  %vm2987_vm7 = vcmp.gt.f32.partialorder %v2983_v55, 0.0  ;;  %vm2989_vm8 = vcmp.gt.f32.partialorder %v2985_v6, 0.0 }
 0x495   :  { %v2993_v20 = vmul.f32 1.442695, %v2984_v57  ;;  %v2997_v50 = vmul.f32 1.442695, %v2986_v24  ;;  %vm2988_vm10 = vcmp.gt.f32.partialorder %v2984_v57, 0.0  ;;  %vm2990_vm11 = vcmp.gt.f32.partialorder %v2986_v24, 0.0 }
 0x496   :  { %3720 = vpow2.f32 %v2991_v59  ;;  %v3710_v3 = vld [vmem:[#allocation6 + $0x38] sm:$0xff]  }
 0x497   :  { %3722 = vpow2.f32 %v2995_v11  ;;  %v3711_v15 = vld [vmem:[#allocation6 + $0xb8] sm:$0xff]  }
 0x498   :  { %3724 = vpow2.f32 %v2993_v20 }
 0x499   :  { %3726 = vpow2.f32 %v2997_v50 }
 0x4a0   :  { %v3721_v53 = vpop.eup %3720 }
 0x4a1   :  { %v3723_v52 = vpop.eup %3722  ;;  %v3562_v26 = vadd.f32 -1.0, %v3721_v53 }
 0x4a2   :  { %v3725_v46 = vpop.eup %3724  ;;  %v3564_v45 = vadd.f32 -1.0, %v3723_v52 }
 0x4a3   :  { %v3727_v33 = vpop.eup %3726  ;;  %v3563_v21 = vadd.f32 -1.0, %v3725_v46  ;;  %v3003_v43 = vsel %vm2987_vm7, %v2983_v55, %v3562_v26 }
 0x4a4   :  { %v3565_v60 = vadd.f32 -1.0, %v3727_v33  ;;  %v3008_v54 = vpack.c.bf16 %v3003_v43, %v3003_v43  ;;  %v3005_v22 = vsel %vm2989_vm8, %v2985_v6, %v3564_v45 }
 0x4a5   :  { %v3004_v58 = vsel %vm2988_vm10, %v2984_v57, %v3563_v21  ;;  %v3010_v34 = vpack.c.bf16 %v3005_v22, %v3005_v22 }
 0x4a6   :  { %v3009_v61 = vpack.c.bf16 %v3004_v58, %v3004_v58  ;;  %v3006_v62 = vsel %vm2990_vm11, %v2986_v24, %v3565_v60  ;;  %v3022_v63 = vsel %vm216_vm15, %v3008_v54, 0 }
 0x4a7   :  { %v3011_v13 = vpack.c.bf16 %v3006_v62, %v3006_v62  ;;  %v3028_v49 = vsel %vm216_vm15, %v3010_v34, 0 }
 0x4a8   :  { %3566 = vmatprep.subr.msk.bf16.mxu0 %vm216_vm15, %v3009_v61 }
 0x4a9   :  { %3568 = vmatprep.subr.msk.bf16.mxu1 %vm216_vm15, %v3011_v13  ;;  %3034 = vmatpush1.bf16.msra.mxu0 %v3022_v63 }
 0x4aa   :  { %3075 = vmatpush1.bf16.msra.mxu1 %v3028_v49  ;;  %3602 = vmatprep.subr.bf16.mxu0 %v3680_v19 }
 0x4ab   :  { %3624 = vmatprep.subr.bf16.mxu1 %v3681_v18 }
 0x4ac   :  { %3567 = vmatmul.mubr.msk.bf16.vlgmr.msra.gmra.mrb[72].mxu0 %vm212_vm1, %v3007_v36 }
 0x4ad   :  { %3569 = vmatmul.mubr.msk.bf16.vlgmr.msra.gmra.mrb[72].mxu1 %vm212_vm1, %v3007_v36  ;;  %3603 = vmatpush3.bf16.msra.mxu0 %v3682_v40 }
 0x4ae   :  { %3625 = vmatpush3.bf16.msra.mxu1 %v3683_v37  ;;  %3604 = vmatprep.subr.bf16.mxu0 %v3684_v41 }
 0x4af   :  { %3626 = vmatprep.subr.bf16.mxu1 %v3685_v30 }
 0x4b1   :  { %3605 = vmatpush3.bf16.msra.mxu0 %v3686_v7 }
 0x4b2   :  { %3627 = vmatpush3.bf16.msra.mxu1 %v3687_v5  ;;  %3606 = vmatprep.subr.bf16.mxu0 %v3688_v8 }
 0x4b3   :  { %3628 = vmatprep.subr.bf16.mxu1 %v3689_v39 }
 0x4b5   :  { %3607 = vmatpush3.bf16.msra.mxu0 %v3690_v12 }
 0x4b6   :  { %3629 = vmatpush3.bf16.msra.mxu1 %v3691_v27  ;;  %3608 = vmatprep.subr.bf16.mxu0 %v3692_v9 }
 0x4b7   :  { %3630 = vmatprep.subr.bf16.mxu1 %v3693_v1 }
 0x4b9   :  { %3609 = vmatpush3.bf16.msra.mxu0 %v3694_v14 }
 0x4ba   :  { %3631 = vmatpush3.bf16.msra.mxu1 %v3695_v28  ;;  %3610 = vmatprep.subr.bf16.mxu0 %v3696_v10 }
 0x4bb   :  { %3632 = vmatprep.subr.bf16.mxu1 %v3697_v16 }
 0x4bd   :  { %3611 = vmatpush3.bf16.msra.mxu0 %v3698_v48 }
 0x4be   :  { %3633 = vmatpush3.bf16.msra.mxu1 %v3699_v23  ;;  %3612 = vmatprep.subr.bf16.mxu0 %v3700_v25 }
 0x4bf   :  { %3634 = vmatprep.subr.bf16.mxu1 %v3701_v29 }
 0x4c1   :  { %3613 = vmatpush3.bf16.msra.mxu0 %v3702_v32 }
 0x4c2   :  { %3635 = vmatpush3.bf16.msra.mxu1 %v3703_v0  ;;  %3614 = vmatprep.subr.bf16.mxu0 %v3704_v38 }
 0x4c3   :  { %3636 = vmatprep.subr.bf16.mxu1 %v3705_v44 }
 0x4c5   :  { %3615 = vmatpush3.bf16.msra.mxu0 %v3706_v42 }
 0x4c6   :  { %3637 = vmatpush3.bf16.msra.mxu1 %v3707_v17  ;;  %3616 = vmatprep.subr.bf16.mxu0 %v3708_v2 }
 0x4c7   :  { %3638 = vmatprep.subr.bf16.mxu1 %v3709_v47 }
 0x4c9   :  { %3617 = vmatpush3.bf16.msra.mxu0 %v3710_v3 }
 0x4ca   :  { %3639 = vmatpush3.bf16.msra.mxu1 %v3711_v15 }
 0x57f   :  { %v3067_v51 = vpop.f32.mrb[72].mxu0 }
 0x580   :  { %v3108_v35 = vpop.f32.mrb[72].mxu1  ;;  %v3069_v55 = vpop.f32.mrb[73].mxu0  ;;  %v3068_v6 = vadd.f32 %v3067_v51, %v3016_v4 }
 0x581   :  { %v3110_v56 = vpop.f32.mrb[73].mxu1  ;;  %v3070_v31 = vadd.f32 %v3069_v55, %v3016_v4  ;;  %v3109_v57 = vadd.f32 %v3108_v35, %v3016_v4  ;;  %v3071_v24 = vpop.f32.mrb[74].mxu0 }
 0x582   :  { %v3111_v59 = vadd.f32 %v3110_v56, %v3016_v4  ;;  %v3112_v11 = vpop.f32.mrb[74].mxu1  ;;  %v3072_v20 = vpop.f32.mrb[75].mxu0  ;;  %v3115_v52 = vpack.c.bf16 %v3068_v6, %v3068_v6 }
 0x583   :  { %v3113_v50 = vpop.f32.mrb[75].mxu1  ;;  %v3116_v53 = vpack.c.bf16 %v3070_v31, %v3070_v31  ;;  %v3117_v46 = vpack.c.bf16 %v3109_v57, %v3109_v57 }
 0x584   :  { %v3118_v26 = vpack.c.bf16 %v3111_v59, %v3111_v59 }
 0x585   :  { %3407 = vmatprep.mubr.bf16.mxu0 %v3116_v53 }
 0x586   :  { %3447 = vmatprep.mubr.bf16.mxu1 %v3118_v26  ;;  %3408 = vmatmul.mubr.bf16.vlgmr.msra.gmra.mrb[76].mxu0 %v3115_v52 }
 0x587   :  { %3448 = vmatmul.mubr.bf16.vlgmr.msra.gmra.mrb[76].mxu1 %v3117_v46 }
 0x659   :  { %v3618_v45 = vpop.f32.mrb[76].mxu0 }
 0x65a   :  { %v3640_v33 = vpop.f32.mrb[76].mxu1  ;;  %v3619_v21 = vpop.f32.mrb[77].mxu0 }
 0x65b   :  { %v3620_v43 = vadd.f32 %v3619_v21, %v3618_v45  ;;  %v3641_v60 = vpop.f32.mrb[77].mxu1  ;;  %v3621_v54 = vpop.f32.mrb[78].mxu0 }
 0x65c   :  { %v3642_v22 = vadd.f32 %v3641_v60, %v3640_v33  ;;  %v3643_v58 = vpop.f32.mrb[78].mxu1  ;;  %v3622_v34 = vpop.f32.mrb[79].mxu0 }
 0x65d   :  { %v3644_v61 = vpop.f32.mrb[79].mxu1 }
 0x65e   :  { %v3450_v62 = vadd.f32 %v3642_v22, %v3620_v43 }
 0x660   :  { %3455 = vst [vmem:[#allocation8] sm:$0xff] %v3450_v62 }
 0x661   :  { %3783 = shalt.err (!%p3780_p6)
}
 0x662   :  { %s3784_s28 = scalar_lea.hbm %s4622_s9, 128 }
 0x663   :  { %p3785_p7 = scmp.ne.s32.totalorder %s4622_s9, %s3784_s28  ;;  %p3788_p8 = scmp.lt.u32.totalorder %s3784_s28, %s4622_s9 }
 0x665   :  { %p3790_p9 = pnand %p3788_p8, %p3785_p7 }
 0x667   :  { %3793 = shalt.err (!%p3790_p9)
}
 0x668   :  { %3465 = dma.vmem_to_hbm [thread:$0]  %s3463_s24, 128, %s4622_s9, [#allocation5]  }
 0x669   :  { %3798 = dma.done.wait [#allocation5], 128  }
 0x66a   :  { %3799 = vsyncadd [#allocation5], 4294967168 }
 0x66b   :  { %3469 = vsyncpa [#allocation4], 1 }
 0x66c   :  { %3470 = vsyncpa [#allocation7], 1 }
 0x66d   :  { %3471 = vsyncpa [#allocation5], 1 }

</bundles_post_ra>
